<compile_context>
chip_gen: v7x
topology: tpu7x:2x2x1
jax: 0.10.0
libtpu: 0.0.40
codegen_flags: <defaults>
</compile_context>

<pallas_src>
import math

import jax
import jax.numpy as jnp
import numpy as np
from jax import lax
from jax.experimental import pallas as pl
from jax.experimental.pallas import tpu as pltpu

# ----------------------------- config -------------------------------------
D_MODEL = 32
NUM_FIELDS = 4                                   # [month, day, weekday, hour]  (freq='h')
MONTH_SIZE, DAY_SIZE, WEEKDAY_SIZE, HOUR_SIZE = 13, 32, 7, 24
# row offsets of each field inside the 128-row base table (8-aligned blocks, zero padded)
MONTH_OFF, DAY_OFF, WEEKDAY_OFF, HOUR_OFF = 0, 16, 48, 56
FIELD_OFFSETS = (MONTH_OFF, DAY_OFF, WEEKDAY_OFF, HOUR_OFF)
BASE_ROWS = 128                                  # exactly one lane tile; rows 80..127 are zero
ZERO_ROW = BASE_ROWS - 1                         # guaranteed-zero row used for padding
MAX_TILE_G = 512                                 # stored rows / grid step (= PACK*512 logical rows)
                                                 # ~2.3 MiB live VMEM -> fine on v5e/v6e/v7x defaults


def _pack_factor(d_model):
    # how many logical rows are packed into one 128-lane stored row
    return 128 // d_model if (d_model < 128 and 128 % d_model == 0) else 1


# ----------------------------- kernel --------------------------------------
def temporal_embedding_kernel(idx_ref, tab_ref, o_ref):
    # idx_ref: [TILE_G, PACK] int32; entry [g, j] bit-packs the 4 already-offset field
    #          indices (8 bits each) of logical row g*PACK + j.
    # tab_ref: [PACK*128, PACK*D] f32 block-diagonal combined fixed-embedding table.
    # o_ref  : [TILE_G, PACK*D] f32 (full 128-lane stored rows when D divides 128).
    tile_g, pack = idx_ref.shape
    k_dim = tab_ref.shape[0]

    idx = idx_ref[...]                                           # single load of the index block
    iota = lax.broadcasted_iota(jnp.int32, (tile_g, k_dim), 1)   # one iota reused by all compares

    onehot_b = None
    for j in range(pack):                         # slot within the stored row
        packed = idx[:, j:j + 1]                  # [TILE_G, 1]
        for f in range(NUM_FIELDS):               # month / day / weekday / hour
            row = ((packed >> (8 * f)) & 0xFF) + j * BASE_ROWS   # narrow [TILE_G,1] math
            hit = row == iota                                    # disjoint lanes across (j, f)
            onehot_b = hit if onehot_b is None else (onehot_b | hit)
    onehot = onehot_b.astype(jnp.float32)         # single bool -> f32 convert

    # one MXU push selects-and-sums all four embeddings for PACK logical rows at once
    o_ref[...] = jnp.dot(onehot, tab_ref[...],
                         preferred_element_type=jnp.float32,
                         precision=lax.Precision.HIGHEST)


# ----------------------------- wrapper --------------------------------------
def temporal_embedding_forward(x_mark, packed_table):
    """x_mark: [B, L, 4] int (month, day, weekday, hour).  Returns [B, L, D] f32."""
    B, L, F = x_mark.shape
    assert F == NUM_FIELDS
    pack = packed_table.shape[0] // BASE_ROWS
    D = packed_table.shape[1] // pack
    M = B * L

    # offset each field into its row block, then bit-pack the 4 indices (< 128 each)
    # into one int32 per logical row (4x less index HBM traffic).
    idx = x_mark.reshape(M, F).astype(jnp.int32) + jnp.asarray(FIELD_OFFSETS, jnp.int32)[None, :]
    packed = (idx[:, 0] | (idx[:, 1] << 8) | (idx[:, 2] << 16) | (idx[:, 3] << 24))  # [M] int32

    # group PACK logical rows per stored row; tile stored rows for the pipelined grid
    G = pl.cdiv(M, pack)
    tile_g = min(MAX_TILE_G, pl.cdiv(G, 8) * 8)           # sublane-aligned, VMEM-bounded
    Gp = pl.cdiv(G, tile_g) * tile_g
    pad_rows = Gp * pack - M
    if pad_rows:
        zero_packed = ZERO_ROW | (ZERO_ROW << 8) | (ZERO_ROW << 16) | (ZERO_ROW << 24)
        packed = jnp.concatenate(
            [packed, jnp.full((pad_rows,), zero_packed, jnp.int32)], axis=0)
    idx2d = packed.reshape(Gp, pack)

    K, N = packed_table.shape                              # (pack*128, pack*D)
    cost = pl.CostEstimate(
        flops=2 * Gp * K * N,
        transcendentals=0,
        bytes_accessed=Gp * pack * 4 + K * N * 4 + Gp * N * 4,
    )

    out = pl.pallas_call(
        temporal_embedding_kernel,
        out_shape=jax.ShapeDtypeStruct((Gp, N), jnp.float32),
        grid_spec=pltpu.PrefetchScalarGridSpec(
            num_scalar_prefetch=0,
            grid=(Gp // tile_g,),
            in_specs=[
                pl.BlockSpec((tile_g, pack), lambda i: (i, 0)),   # packed indices (pipelined)
                pl.BlockSpec((K, N), lambda i: (0, 0)),           # table: constant block, fetched once
            ],
            out_specs=pl.BlockSpec((tile_g, N), lambda i: (i, 0)),
        ),
        compiler_params=pltpu.CompilerParams(
            dimension_semantics=("parallel",),                    # shard rows across v7x's 2 TCs
        ),
        cost_estimate=cost,
    )(idx2d, packed_table)

    # [Gp, PACK*D] -> [Gp*PACK, D] is a free row-major reinterpretation
    return out.reshape(Gp * pack, D)[:M].reshape(B, L, D)


# ----------------------------- param builders -------------------------------
def fixed_embedding_weight(c_in, d_model):
    # exact FixedEmbedding weights from the PyTorch module
    pos = np.arange(c_in, dtype=np.float32)[:, None]
    div = np.exp(np.arange(0, d_model, 2, dtype=np.float32) * (-math.log(10000.0) / d_model))
    w = np.zeros((c_in, d_model), np.float32)
    w[:, 0::2] = np.sin(pos * div)
    w[:, 1::2] = np.cos(pos * div)
    return w


def build_base_table(d_model):
    tab = np.zeros((BASE_ROWS, d_model), np.float32)
    tab[MONTH_OFF:MONTH_OFF + MONTH_SIZE] = fixed_embedding_weight(MONTH_SIZE, d_model)
    tab[DAY_OFF:DAY_OFF + DAY_SIZE] = fixed_embedding_weight(DAY_SIZE, d_model)
    tab[WEEKDAY_OFF:WEEKDAY_OFF + WEEKDAY_SIZE] = fixed_embedding_weight(WEEKDAY_SIZE, d_model)
    tab[HOUR_OFF:HOUR_OFF + HOUR_SIZE] = fixed_embedding_weight(HOUR_SIZE, d_model)
    return tab


def build_packed_table(d_model):
    base = build_base_table(d_model)
    pack = _pack_factor(d_model)
    tab = np.zeros((pack * BASE_ROWS, pack * d_model), np.float32)
    for j in range(pack):
        tab[j * BASE_ROWS:(j + 1) * BASE_ROWS, j * d_model:(j + 1) * d_model] = base
    return jnp.asarray(tab, jnp.float32)


# ----------------------------- pure-JAX reference ---------------------------
def reference_forward(x_mark, d_model):
    mon = jnp.asarray(fixed_embedding_weight(MONTH_SIZE, d_model))
    day = jnp.asarray(fixed_embedding_weight(DAY_SIZE, d_model))
    wk = jnp.asarray(fixed_embedding_weight(WEEKDAY_SIZE, d_model))
    hr = jnp.asarray(fixed_embedding_weight(HOUR_SIZE, d_model))
    xm = x_mark.astype(jnp.int32)
    return (hr[xm[..., 3]] + wk[xm[..., 2]] + day[xm[..., 1]] + mon[xm[..., 0]])


# ----------------------------- main ------------------------------------------
if __name__ == "__main__":
    B, L = 2, 16
    key = jax.random.PRNGKey(0)
    k1, k2, k3, k4 = jax.random.split(key, 4)

    x_mark = jnp.concatenate(
        [
            jax.random.randint(k1, (B, L, 1), 0, MONTH_SIZE),
            jax.random.randint(k2, (B, L, 1), 0, DAY_SIZE),
            jax.random.randint(k3, (B, L, 1), 0, WEEKDAY_SIZE),
            jax.random.randint(k4, (B, L, 1), 0, HOUR_SIZE),
        ],
        axis=-1,
    ).astype(jnp.int32)

    packed_table = build_packed_table(D_MODEL)

    out = temporal_embedding_forward(x_mark, packed_table)
    out = jax.block_until_ready(out)

    ref = jax.block_until_ready(reference_forward(x_mark, D_MODEL))
    np.testing.assert_allclose(np.asarray(out), np.asarray(ref), rtol=1e-5, atol=1e-5)

    print("KERNEL_OK")
</pallas_src>

<mosaic_0001>
module attributes {stable_mosaic.version = 11 : i64} {
  func.func @temporal_embedding_kernel(%arg0: i32, %arg1: memref<8x4xi32, #tpu.memory_space<vmem>>, %arg2: memref<512x128xf32, #tpu.memory_space<vmem>>, %arg3: memref<8x128xf32, #tpu.memory_space<vmem>>) attributes {dimension_semantics = [#tpu.dimension_semantics<parallel>], iteration_bounds = array<i64: 1>, scalar_prefetch = 0 : i64, scratch_operands = 0 : i64, tpu.core_type = #tpu.core_type<tc>, window_params = [{transform_indices = @transform_0, window_bounds = array<i64: 8, 4>}, {pipeline_mode = #tpu.pipeline_mode<synchronous>, transform_indices = @transform_1, window_bounds = array<i64: 512, 128>}, {transform_indices = @transform_2, window_bounds = array<i64: 8, 128>}]} {
    %c0 = arith.constant 0 : index
    %c0_0 = arith.constant 0 : index
    %0 = vector.load %arg1[%c0, %c0_0] : memref<8x4xi32, #tpu.memory_space<vmem>>, vector<8x4xi32>
    %1 = tpu.iota {dimensions = array<i32: 1>} : vector<8x512xi32>
    %2 = vector.extract_strided_slice %0 {offsets = [0, 0], sizes = [8, 1], strides = [1, 1]} : vector<8x4xi32> to vector<8x1xi32>
    %c0_i32 = arith.constant 0 : i32
    %3 = vector.broadcast %c0_i32 : i32 to vector<8x1xi32>
    %4 = arith.shrsi %2, %3 : vector<8x1xi32>
    %c255_i32 = arith.constant 255 : i32
    %5 = vector.broadcast %c255_i32 : i32 to vector<8x1xi32>
    %6 = arith.andi %4, %5 : vector<8x1xi32>
    %c0_i32_1 = arith.constant 0 : i32
    %7 = vector.broadcast %c0_i32_1 : i32 to vector<8x1xi32>
    %8 = arith.addi %6, %7 : vector<8x1xi32>
    %9 = vector.broadcast %8 : vector<8x1xi32> to vector<8x512xi32>
    %10 = arith.cmpi eq, %9, %1 : vector<8x512xi32>
    %c8_i32 = arith.constant 8 : i32
    %11 = vector.broadcast %c8_i32 : i32 to vector<8x1xi32>
    %12 = arith.shrsi %2, %11 : vector<8x1xi32>
    %c255_i32_2 = arith.constant 255 : i32
    %13 = vector.broadcast %c255_i32_2 : i32 to vector<8x1xi32>
    %14 = arith.andi %12, %13 : vector<8x1xi32>
    %c0_i32_3 = arith.constant 0 : i32
    %15 = vector.broadcast %c0_i32_3 : i32 to vector<8x1xi32>
    %16 = arith.addi %14, %15 : vector<8x1xi32>
    %17 = vector.broadcast %16 : vector<8x1xi32> to vector<8x512xi32>
    %18 = arith.cmpi eq, %17, %1 : vector<8x512xi32>
    %19 = arith.ori %10, %18 : vector<8x512xi1>
    %c16_i32 = arith.constant 16 : i32
    %20 = vector.broadcast %c16_i32 : i32 to vector<8x1xi32>
    %21 = arith.shrsi %2, %20 : vector<8x1xi32>
    %c255_i32_4 = arith.constant 255 : i32
    %22 = vector.broadcast %c255_i32_4 : i32 to vector<8x1xi32>
    %23 = arith.andi %21, %22 : vector<8x1xi32>
    %c0_i32_5 = arith.constant 0 : i32
    %24 = vector.broadcast %c0_i32_5 : i32 to vector<8x1xi32>
    %25 = arith.addi %23, %24 : vector<8x1xi32>
    %26 = vector.broadcast %25 : vector<8x1xi32> to vector<8x512xi32>
    %27 = arith.cmpi eq, %26, %1 : vector<8x512xi32>
    %28 = arith.ori %19, %27 : vector<8x512xi1>
    %c24_i32 = arith.constant 24 : i32
    %29 = vector.broadcast %c24_i32 : i32 to vector<8x1xi32>
    %30 = arith.shrsi %2, %29 : vector<8x1xi32>
    %c255_i32_6 = arith.constant 255 : i32
    %31 = vector.broadcast %c255_i32_6 : i32 to vector<8x1xi32>
    %32 = arith.andi %30, %31 : vector<8x1xi32>
    %c0_i32_7 = arith.constant 0 : i32
    %33 = vector.broadcast %c0_i32_7 : i32 to vector<8x1xi32>
    %34 = arith.addi %32, %33 : vector<8x1xi32>
    %35 = vector.broadcast %34 : vector<8x1xi32> to vector<8x512xi32>
    %36 = arith.cmpi eq, %35, %1 : vector<8x512xi32>
    %37 = arith.ori %28, %36 : vector<8x512xi1>
    %38 = vector.extract_strided_slice %0 {offsets = [0, 1], sizes = [8, 1], strides = [1, 1]} : vector<8x4xi32> to vector<8x1xi32>
    %c0_i32_8 = arith.constant 0 : i32
    %39 = vector.broadcast %c0_i32_8 : i32 to vector<8x1xi32>
    %40 = arith.shrsi %38, %39 : vector<8x1xi32>
    %c255_i32_9 = arith.constant 255 : i32
    %41 = vector.broadcast %c255_i32_9 : i32 to vector<8x1xi32>
    %42 = arith.andi %40, %41 : vector<8x1xi32>
    %c128_i32 = arith.constant 128 : i32
    %43 = vector.broadcast %c128_i32 : i32 to vector<8x1xi32>
    %44 = arith.addi %42, %43 : vector<8x1xi32>
    %45 = vector.broadcast %44 : vector<8x1xi32> to vector<8x512xi32>
    %46 = arith.cmpi eq, %45, %1 : vector<8x512xi32>
    %47 = arith.ori %37, %46 : vector<8x512xi1>
    %c8_i32_10 = arith.constant 8 : i32
    %48 = vector.broadcast %c8_i32_10 : i32 to vector<8x1xi32>
    %49 = arith.shrsi %38, %48 : vector<8x1xi32>
    %c255_i32_11 = arith.constant 255 : i32
    %50 = vector.broadcast %c255_i32_11 : i32 to vector<8x1xi32>
    %51 = arith.andi %49, %50 : vector<8x1xi32>
    %c128_i32_12 = arith.constant 128 : i32
    %52 = vector.broadcast %c128_i32_12 : i32 to vector<8x1xi32>
    %53 = arith.addi %51, %52 : vector<8x1xi32>
    %54 = vector.broadcast %53 : vector<8x1xi32> to vector<8x512xi32>
    %55 = arith.cmpi eq, %54, %1 : vector<8x512xi32>
    %56 = arith.ori %47, %55 : vector<8x512xi1>
    %c16_i32_13 = arith.constant 16 : i32
    %57 = vector.broadcast %c16_i32_13 : i32 to vector<8x1xi32>
    %58 = arith.shrsi %38, %57 : vector<8x1xi32>
    %c255_i32_14 = arith.constant 255 : i32
    %59 = vector.broadcast %c255_i32_14 : i32 to vector<8x1xi32>
    %60 = arith.andi %58, %59 : vector<8x1xi32>
    %c128_i32_15 = arith.constant 128 : i32
    %61 = vector.broadcast %c128_i32_15 : i32 to vector<8x1xi32>
    %62 = arith.addi %60, %61 : vector<8x1xi32>
    %63 = vector.broadcast %62 : vector<8x1xi32> to vector<8x512xi32>
    %64 = arith.cmpi eq, %63, %1 : vector<8x512xi32>
    %65 = arith.ori %56, %64 : vector<8x512xi1>
    %c24_i32_16 = arith.constant 24 : i32
    %66 = vector.broadcast %c24_i32_16 : i32 to vector<8x1xi32>
    %67 = arith.shrsi %38, %66 : vector<8x1xi32>
    %c255_i32_17 = arith.constant 255 : i32
    %68 = vector.broadcast %c255_i32_17 : i32 to vector<8x1xi32>
    %69 = arith.andi %67, %68 : vector<8x1xi32>
    %c128_i32_18 = arith.constant 128 : i32
    %70 = vector.broadcast %c128_i32_18 : i32 to vector<8x1xi32>
    %71 = arith.addi %69, %70 : vector<8x1xi32>
    %72 = vector.broadcast %71 : vector<8x1xi32> to vector<8x512xi32>
    %73 = arith.cmpi eq, %72, %1 : vector<8x512xi32>
    %74 = arith.ori %65, %73 : vector<8x512xi1>
    %75 = vector.extract_strided_slice %0 {offsets = [0, 2], sizes = [8, 1], strides = [1, 1]} : vector<8x4xi32> to vector<8x1xi32>
    %c0_i32_19 = arith.constant 0 : i32
    %76 = vector.broadcast %c0_i32_19 : i32 to vector<8x1xi32>
    %77 = arith.shrsi %75, %76 : vector<8x1xi32>
    %c255_i32_20 = arith.constant 255 : i32
    %78 = vector.broadcast %c255_i32_20 : i32 to vector<8x1xi32>
    %79 = arith.andi %77, %78 : vector<8x1xi32>
    %c256_i32 = arith.constant 256 : i32
    %80 = vector.broadcast %c256_i32 : i32 to vector<8x1xi32>
    %81 = arith.addi %79, %80 : vector<8x1xi32>
    %82 = vector.broadcast %81 : vector<8x1xi32> to vector<8x512xi32>
    %83 = arith.cmpi eq, %82, %1 : vector<8x512xi32>
    %84 = arith.ori %74, %83 : vector<8x512xi1>
    %c8_i32_21 = arith.constant 8 : i32
    %85 = vector.broadcast %c8_i32_21 : i32 to vector<8x1xi32>
    %86 = arith.shrsi %75, %85 : vector<8x1xi32>
    %c255_i32_22 = arith.constant 255 : i32
    %87 = vector.broadcast %c255_i32_22 : i32 to vector<8x1xi32>
    %88 = arith.andi %86, %87 : vector<8x1xi32>
    %c256_i32_23 = arith.constant 256 : i32
    %89 = vector.broadcast %c256_i32_23 : i32 to vector<8x1xi32>
    %90 = arith.addi %88, %89 : vector<8x1xi32>
    %91 = vector.broadcast %90 : vector<8x1xi32> to vector<8x512xi32>
    %92 = arith.cmpi eq, %91, %1 : vector<8x512xi32>
    %93 = arith.ori %84, %92 : vector<8x512xi1>
    %c16_i32_24 = arith.constant 16 : i32
    %94 = vector.broadcast %c16_i32_24 : i32 to vector<8x1xi32>
    %95 = arith.shrsi %75, %94 : vector<8x1xi32>
    %c255_i32_25 = arith.constant 255 : i32
    %96 = vector.broadcast %c255_i32_25 : i32 to vector<8x1xi32>
    %97 = arith.andi %95, %96 : vector<8x1xi32>
    %c256_i32_26 = arith.constant 256 : i32
    %98 = vector.broadcast %c256_i32_26 : i32 to vector<8x1xi32>
    %99 = arith.addi %97, %98 : vector<8x1xi32>
    %100 = vector.broadcast %99 : vector<8x1xi32> to vector<8x512xi32>
    %101 = arith.cmpi eq, %100, %1 : vector<8x512xi32>
    %102 = arith.ori %93, %101 : vector<8x512xi1>
    %c24_i32_27 = arith.constant 24 : i32
    %103 = vector.broadcast %c24_i32_27 : i32 to vector<8x1xi32>
    %104 = arith.shrsi %75, %103 : vector<8x1xi32>
    %c255_i32_28 = arith.constant 255 : i32
    %105 = vector.broadcast %c255_i32_28 : i32 to vector<8x1xi32>
    %106 = arith.andi %104, %105 : vector<8x1xi32>
    %c256_i32_29 = arith.constant 256 : i32
    %107 = vector.broadcast %c256_i32_29 : i32 to vector<8x1xi32>
    %108 = arith.addi %106, %107 : vector<8x1xi32>
    %109 = vector.broadcast %108 : vector<8x1xi32> to vector<8x512xi32>
    %110 = arith.cmpi eq, %109, %1 : vector<8x512xi32>
    %111 = arith.ori %102, %110 : vector<8x512xi1>
    %112 = vector.extract_strided_slice %0 {offsets = [0, 3], sizes = [8, 1], strides = [1, 1]} : vector<8x4xi32> to vector<8x1xi32>
    %c0_i32_30 = arith.constant 0 : i32
    %113 = vector.broadcast %c0_i32_30 : i32 to vector<8x1xi32>
    %114 = arith.shrsi %112, %113 : vector<8x1xi32>
    %c255_i32_31 = arith.constant 255 : i32
    %115 = vector.broadcast %c255_i32_31 : i32 to vector<8x1xi32>
    %116 = arith.andi %114, %115 : vector<8x1xi32>
    %c384_i32 = arith.constant 384 : i32
    %117 = vector.broadcast %c384_i32 : i32 to vector<8x1xi32>
    %118 = arith.addi %116, %117 : vector<8x1xi32>
    %119 = vector.broadcast %118 : vector<8x1xi32> to vector<8x512xi32>
    %120 = arith.cmpi eq, %119, %1 : vector<8x512xi32>
    %121 = arith.ori %111, %120 : vector<8x512xi1>
    %c8_i32_32 = arith.constant 8 : i32
    %122 = vector.broadcast %c8_i32_32 : i32 to vector<8x1xi32>
    %123 = arith.shrsi %112, %122 : vector<8x1xi32>
    %c255_i32_33 = arith.constant 255 : i32
    %124 = vector.broadcast %c255_i32_33 : i32 to vector<8x1xi32>
    %125 = arith.andi %123, %124 : vector<8x1xi32>
    %c384_i32_34 = arith.constant 384 : i32
    %126 = vector.broadcast %c384_i32_34 : i32 to vector<8x1xi32>
    %127 = arith.addi %125, %126 : vector<8x1xi32>
    %128 = vector.broadcast %127 : vector<8x1xi32> to vector<8x512xi32>
    %129 = arith.cmpi eq, %128, %1 : vector<8x512xi32>
    %130 = arith.ori %121, %129 : vector<8x512xi1>
    %c16_i32_35 = arith.constant 16 : i32
    %131 = vector.broadcast %c16_i32_35 : i32 to vector<8x1xi32>
    %132 = arith.shrsi %112, %131 : vector<8x1xi32>
    %c255_i32_36 = arith.constant 255 : i32
    %133 = vector.broadcast %c255_i32_36 : i32 to vector<8x1xi32>
    %134 = arith.andi %132, %133 : vector<8x1xi32>
    %c384_i32_37 = arith.constant 384 : i32
    %135 = vector.broadcast %c384_i32_37 : i32 to vector<8x1xi32>
    %136 = arith.addi %134, %135 : vector<8x1xi32>
    %137 = vector.broadcast %136 : vector<8x1xi32> to vector<8x512xi32>
    %138 = arith.cmpi eq, %137, %1 : vector<8x512xi32>
    %139 = arith.ori %130, %138 : vector<8x512xi1>
    %c24_i32_38 = arith.constant 24 : i32
    %140 = vector.broadcast %c24_i32_38 : i32 to vector<8x1xi32>
    %141 = arith.shrsi %112, %140 : vector<8x1xi32>
    %c255_i32_39 = arith.constant 255 : i32
    %142 = vector.broadcast %c255_i32_39 : i32 to vector<8x1xi32>
    %143 = arith.andi %141, %142 : vector<8x1xi32>
    %c384_i32_40 = arith.constant 384 : i32
    %144 = vector.broadcast %c384_i32_40 : i32 to vector<8x1xi32>
    %145 = arith.addi %143, %144 : vector<8x1xi32>
    %146 = vector.broadcast %145 : vector<8x1xi32> to vector<8x512xi32>
    %147 = arith.cmpi eq, %146, %1 : vector<8x512xi32>
    %148 = arith.ori %139, %147 : vector<8x512xi1>
    %149 = arith.extui %148 : vector<8x512xi1> to vector<8x512xi32>
    %150 = arith.sitofp %149 : vector<8x512xi32> to vector<8x512xf32>
    %c0_41 = arith.constant 0 : index
    %c0_42 = arith.constant 0 : index
    %151 = vector.load %arg2[%c0_41, %c0_42] : memref<512x128xf32, #tpu.memory_space<vmem>>, vector<512x128xf32>
    %cst = arith.constant dense<0.000000e+00> : vector<8x128xf32>
    %152 = tpu.matmul %150, %151, %cst {dimension_numbers = #tpu.dot_dimension_numbers<[1], [0], [0], [1], [0, 0, 1, 1], [], []>, precision = #tpu.contract_precision<fp32>} : vector<8x512xf32>, vector<512x128xf32>, vector<8x128xf32> -> vector<8x128xf32>
    %c0_43 = arith.constant 0 : index
    %c0_44 = arith.constant 0 : index
    %153 = vector.load %arg3[%c0_43, %c0_44] : memref<8x128xf32, #tpu.memory_space<vmem>>, vector<8x128xf32>
    tpu.vector_store %arg3[%c0_43, %c0_44], %152 {strides = array<i32>} : memref<8x128xf32, #tpu.memory_space<vmem>>, vector<8x128xf32>,
    return
  }
  func.func @transform_0(%arg0: i32) -> (i32, i32) {
    %c0_i32 = arith.constant 0 : i32
    %c0_i32_0 = arith.constant 0 : i32
    return %arg0, %c0_i32 : i32, i32
  }
  func.func @transform_1(%arg0: i32) -> (i32, i32) {
    %c0_i32 = arith.constant 0 : i32
    %c0_i32_0 = arith.constant 0 : i32
    %c0_i32_1 = arith.constant 0 : i32
    return %c0_i32, %c0_i32_0 : i32, i32
  }
  func.func @transform_2(%arg0: i32) -> (i32, i32) {
    %c0_i32 = arith.constant 0 : i32
    %c0_i32_0 = arith.constant 0 : i32
    return %arg0, %c0_i32 : i32, i32
  }
}

</mosaic_0001>

<bundles_post_ra>
// kernel: tpu_custom_call.1
= control target key start
LH: loop header
LB: loop body
LE: loop exit
PB: predicated region body
PF: predicated region fallthrough
CT: control target
= control target key end

     0   :  { %7 = vsyncpa [#allocation3], 0  ;;  %s4421_s0 = inlined_call_operand.vmem [shape: s32[8,4], index: 0, kind: input, shape index: {}]   ;;  %s4422_s1 = inlined_call_operand.hbm [shape: f32[512,128], index: 1, kind: input, shape index: {}]   ;;  %s4423_s2 = inlined_call_operand.hbm [shape: f32[8,128], index: 2, kind: output, shape index: {}]  }
   0x1   :  { %8 = vsyncpa [#allocation4], 0  ;;  %s2909_s9 = smov [#allocation2]   ;;  %s2861_s13 = scalar_lea.hbm %s4422_s1, 8192 }
   0x2   :  { %s16_s10 = sshll.u32 %s2909_s9, 4  ;;  %p2862_p0 = scmp.ne.s32.totalorder %s4422_s1, %s2861_s13  ;;  %s17_s10 = int_to_ptr.vmem [resolvable:$true] %s16_s10 }
   0x3   :  { %p2865_p1 = scmp.lt.u32.totalorder %s2861_s13, %s4422_s1 }
   0x5   :  { %p2867_p2 = pnand %p2865_p1, %p2862_p0 }
   0x7   :  { %2870 = shalt.err (!%p2867_p2)
}
   0x8   :  { %s2871_s18 = scalar_lea.vmem %s17_s10, 8192  ;;  %p2876_p4 = scmp.lt.s32.totalorder %s17_s10, %s17_s10 }
   0x9   :  { %p2872_p3 = scmp.ne.s32.totalorder %s17_s10, %s2871_s18  ;;  %p2877_p5 = scmp.lt.s32.totalorder %s2871_s18, %s2871_s18 }
   0xb   :  { %p2878_p6 = por %p2877_p5, %p2876_p4 }
   0xd   :  { %p2879_p7 = pnand %p2878_p6, %p2872_p3 }
   0xf   :  { %2882 = shalt.err (!%p2879_p7)
}
  0x10   :  { %s2910_s19 = smov 128   ;;  %s2911_s20 = smov 8  }
  0x11   :  { %22 = dma.hbm_to_vmem [thread:$0]  %s4422_s1, 8192, %s17_s10, [#allocation3], %s2910_s19, %s2910_s19, %s2911_s20  }
  0x12   :  { %2905 = dma.done.wait [#allocation3], 8192  }
  0x13   :  { %2906 = vsyncadd [#allocation3], 4294959104  ;;  %v2912_v0 = vmov 0   ;;  %v26_v1 = vld [vmem:[%s4421_s0] sm:$0xff]  ;;  %v2960_v9 = vld [vmem:[#allocation2 + $0x88] sm:$0xff]  ;;  %v2913_v24 = vmov 1  }
  0x14   :  { %2854 = vset.pattern.permute.xlu1 %v2912_v0  ;;  %2853 = vset.pattern.permute.xlu0 %v2912_v0  ;;  %v2948_v2 = vshrl.u32 %v26_v1, 24  ;;  %v2950_v3 = vand.u32 255, %v26_v1  ;;  %v53_v4 = vshra.s32 %v26_v1, 16  ;;  %v40_v5 = vshra.s32 %v26_v1, 8  ;;  %v2958_v8 = vld [vmem:[#allocation2 + $0x80] sm:$0xff]  ;;  %v2964_v11 = vld [vmem:[#allocation2 + $0x8] sm:$0xff] }
  0x15   :  { %v2962_v10 = vld [vmem:[#allocation2] sm:$0xff]  ;;  %v344_v12 = vand.u32 4294901760, %v2958_v8  ;;  %v347_v13 = vand.u32 4294901760, %v2960_v9  ;;  %v299_v15 = vand.u32 4294901760, %v2964_v11  ;;  %v3006_v31 = vld [vmem:[#allocation2 + $0x90] sm:$0xff]  ;;  %v3008_v32 = vld [vmem:[#allocation2 + $0x98] sm:$0xff] }
  0x16   :  { %69 = vperm.xlu1 %2854, %v2948_v2   ;;  %34 = vperm.xlu0 %2853, %v2950_v3   ;;  %v2954_v6 = vand.u32 255, %v53_v4  ;;  %v2956_v7 = vand.u32 255, %v40_v5  ;;  %v296_v14 = vand.u32 4294901760, %v2962_v10  ;;  %v79_v17 = vadd.s32 128, %v2950_v3  ;;  %v3018_v37 = vld [vmem:[#allocation2 + $0x10] sm:$0xff]  ;;  %v3020_v38 = vld [vmem:[#allocation2 + $0x18] sm:$0xff] }
  0x17   :  { %v2977_v18 = vsub.f32 %v2958_v8, %v344_v12  ;;  %v2982_v19 = vsub.f32 %v2960_v9, %v347_v13  ;;  %v2992_v21 = vsub.f32 %v2964_v11, %v299_v15  ;;  %v115_v28 = vadd.s32 128, %v2948_v2  ;;  %s2917_s0 = smov [#allocation5]  }
  0x18   :  { %v91_v16 = vadd.s32 128, %v2956_v7  ;;  %v2987_v20 = vsub.f32 %v2962_v10, %v296_v14  ;;  %v103_v27 = vadd.s32 128, %v2954_v6  ;;  %v350_v35 = vand.u32 4294901760, %v3006_v31  ;;  %s2026_s1 = sshll.u32 %s2917_s0, 4  ;;  %s2027_s1 = int_to_ptr.vmem [resolvable:$true] %s2026_s1 }
  0x19   :  { %4556 = vst [vmem:[#allocation9_spill] sm:$0xff] %v2992_v21  ;;  %v4439_v22 = vand.u32 4294901760, %v2977_v18  ;;  %v4438_v23 = vand.u32 4294901760, %v2982_v19  ;;  %v4436_v26 = vand.u32 4294901760, %v2992_v21  ;;  %v353_v36 = vand.u32 4294901760, %v3008_v32  ;;  %s2883_s25 = scalar_lea.vmem %s2027_s1, 128  ;;  %p2888_p9 = scmp.lt.s32.totalorder %s2027_s1, %s2027_s1 }
  0x1a   :  { %56 = vperm.xlu1 %2854, %v2954_v6   ;;  %43 = vperm.xlu0 %2853, %v2956_v7   ;;  %4555 = vst [vmem:[#allocation8_spill] sm:$0xff] %v2987_v20  ;;  %v4437_v25 = vand.u32 4294901760, %v2987_v20  ;;  %v302_v41 = vand.u32 4294901760, %v3018_v37  ;;  %v305_v42 = vand.u32 4294901760, %v3020_v38  ;;  %v3027_v45 = vsub.f32 %v3006_v31, %v350_v35  ;;  %p2884_p8 = scmp.ne.s32.totalorder %s2027_s1, %s2883_s25  ;;  %p2889_p10 = scmp.lt.s32.totalorder %s2883_s25, %s2883_s25 }
  0x1b   :  { %v523_v29 = vsub.f32 %v2977_v18, %v4439_v22  ;;  %v530_v30 = vsub.f32 %v2982_v19, %v4438_v23  ;;  %v418_v34 = vsub.f32 %v2992_v21, %v4436_v26  ;;  %v3032_v46 = vsub.f32 %v3008_v32, %v353_v36 }
  0x1c   :  { %v411_v33 = vsub.f32 %v2987_v20, %v4437_v25  ;;  %4557 = vst [vmem:[#allocation10_spill] sm:$0xff] %v3027_v45  ;;  %v127_v47 = vadd.s32 256, %v2950_v3  ;;  %v3038_v49 = vsub.f32 %v3018_v37, %v302_v41  ;;  %v3043_v50 = vsub.f32 %v3020_v38, %v305_v42  ;;  %p2890_p11 = por %p2889_p10, %p2888_p9 }
  0x1d   :  { %v524_v39 = vand.u32 4294901760, %v523_v29  ;;  %v531_v40 = vand.u32 4294901760, %v530_v30  ;;  %v419_v44 = vand.u32 4294901760, %v418_v34  ;;  %4558 = vst [vmem:[#allocation11_spill] sm:$0xff] %v3032_v46  ;;  %v139_v51 = vadd.s32 256, %v2956_v7  ;;  %v3070_v30 = vld [vmem:[#allocation2 + $0x20] sm:$0xff] }
  0x1e   :  { %2856 = vset.pattern.permute.xlu1 %v2913_v24  ;;  %2855 = vset.pattern.permute.xlu0 %v2913_v24  ;;  %v412_v43 = vand.u32 4294901760, %v411_v33  ;;  %v4433_v53 = vand.u32 4294901760, %v3027_v45  ;;  %v4430_v54 = vand.u32 4294901760, %v3032_v46  ;;  %v4429_v55 = vand.u32 4294901760, %v3038_v49  ;;  %v3066_v24 = vld [vmem:[#allocation2 + $0xa8] sm:$0xff]  ;;  %p2891_p12 = pnand %p2890_p11, %p2884_p8 }
  0x1f   :  { %93 = vperm.xlu1 %2856, %v91_v16   ;;  %81 = vperm.xlu0 %2855, %v79_v17   ;;  %v2492_v48 = vpack.c.bf16 %v531_v40, %v524_v39  ;;  %v4428_v56 = vand.u32 4294901760, %v3043_v50  ;;  %v2914_v59 = vmov 2   ;;  %v151_v62 = vadd.s32 256, %v2954_v6  ;;  %v3064_v17 = vld [vmem:[#allocation2 + $0xa0] sm:$0xff]  ;;  %v3072_v33 = vld [vmem:[#allocation2 + $0x28] sm:$0xff] }
  0x20   :  { %v2494_v52 = vpack.c.bf16 %v419_v44, %v412_v43  ;;  %v537_v57 = vsub.f32 %v3027_v45, %v4433_v53  ;;  %v544_v58 = vsub.f32 %v3032_v46, %v4430_v54  ;;  %v425_v60 = vsub.f32 %v3038_v49, %v4429_v55 }
  0x21   :  { %2493 = vmatprep.subr.bf16.mxu1 %v2492_v48  ;;  %v432_v61 = vsub.f32 %v3043_v50, %v4428_v56  ;;  %v175_v1 = vadd.s32 384, %v2950_v3  ;;  %v359_v29 = vand.u32 4294901760, %v3066_v24  ;;  %v163_v34 = vadd.s32 256, %v2948_v2 }
  0x22   :  { %2495 = vmatpush3.bf16.msra.mxu1 %v2494_v52  ;;  %v538_v63 = vand.u32 4294901760, %v537_v57  ;;  %v545_v0 = vand.u32 4294901760, %v544_v58  ;;  %v426_v4 = vand.u32 4294901760, %v425_v60  ;;  %v2915_v3 = vmov 3  }
  0x23   :  { %105 = vperm.xlu1 %2856, %v103_v27   ;;  %117 = vperm.xlu0 %2855, %v115_v28   ;;  %v433_v5 = vand.u32 4294901760, %v432_v61  ;;  %v356_v28 = vand.u32 4294901760, %v3064_v17  ;;  %v308_v39 = vand.u32 4294901760, %v3070_v30  ;;  %v311_v40 = vand.u32 4294901760, %v3072_v33 }
  0x24   :  { %v2496_v16 = vpack.c.bf16 %v545_v0, %v538_v63  ;;  %v211_v43 = vadd.s32 384, %v2948_v2  ;;  %v199_v60 = vadd.s32 384, %v2954_v6  ;;  %v3110_v63 = vld [vmem:[#allocation2 + $0xb0] sm:$0xff]  ;;  %v3112_v0 = vld [vmem:[#allocation2 + $0xb8] sm:$0xff]  ;;  %v3158_v8 = vpack.c.bf16 %v299_v15, %v296_v14  ;;  %v3171_v15 = vld [vmem:[#allocation2 + $0x40] sm:$0xff] }
  0x25   :  { %v2498_v27 = vpack.c.bf16 %v433_v5, %v426_v4  ;;  %v3081_v44 = vsub.f32 %v3064_v17, %v356_v28  ;;  %v3091_v48 = vsub.f32 %v3070_v30, %v308_v39  ;;  %v3096_v2 = vsub.f32 %v3072_v33, %v311_v40  ;;  %v3122_v5 = vld [vmem:[#allocation2 + $0x30] sm:$0xff] }
  0x26   :  { %2497 = vmatprep.subr.bf16.mxu1 %v2496_v16  ;;  %v365_v4 = vand.u32 4294901760, %v3112_v0  ;;  %v3124_v16 = vld [vmem:[#allocation2 + $0x38] sm:$0xff]  ;;  %v3290_v17 = vpack.c.bf16 %v311_v40, %v308_v39 }
  0x27   :  { %2857 = vset.pattern.permute.xlu1 %v2914_v59  ;;  %2858 = vset.pattern.permute.xlu0 %v2914_v59  ;;  %4559 = vst [vmem:[#allocation12_spill] sm:$0xff] %v3081_v44  ;;  %v4425_v57 = vand.u32 4294901760, %v3091_v48  ;;  %v4427_v58 = vand.u32 4294901760, %v3096_v2  ;;  %v187_v59 = vadd.s32 384, %v2956_v7  ;;  %v362_v7 = vand.u32 4294901760, %v3110_v63 }
  0x28   :  { %129 = vperm.xlu1 %2857, %v127_v47   ;;  %141 = vperm.xlu0 %2858, %v139_v51   ;;  %v3086_v47 = vsub.f32 %v3066_v24, %v359_v29  ;;  %v4426_v51 = vand.u32 4294901760, %v3081_v44  ;;  %v3136_v56 = vsub.f32 %v3112_v0, %v365_v4  ;;  %4562 = vst [vmem:[#allocation15_spill] sm:$0xff] %v3290_v17 }
  0x29   :  { %2499 = vmatpush3.bf16.msra.mxu1 %v2498_v27  ;;  %v446_v6 = vsub.f32 %v3096_v2, %v4427_v58  ;;  %v3131_v58 = vsub.f32 %v3110_v63, %v362_v7  ;;  %v4564_v63 = vand.u32 4294901760, %v3124_v16 }
  0x2a   :  { %4560 = vst [vmem:[#allocation13_spill] sm:$0xff] %v3086_v47  ;;  %v4424_v52 = vand.u32 4294901760, %v3086_v47  ;;  %v551_v61 = vsub.f32 %v3081_v44, %v4426_v51 }
  0x2b   :  { %v447_v51 = vand.u32 4294901760, %v446_v6  ;;  %v3164_v6 = vld [vmem:[#allocation2 + $0xc8] sm:$0xff] }
  0x2c   :  { %153 = vperm.xlu1 %2857, %v151_v62   ;;  %2859 = vset.pattern.permute.xlu0 %v2915_v3  ;;  %v558_v62 = vsub.f32 %v3086_v47, %v4424_v52  ;;  %v552_v27 = vand.u32 4294901760, %v551_v61  ;;  %v4444_v52 = vand.u32 4294901760, %v3124_v16  ;;  %v3142_v61 = vpack.c.bf16 %v347_v13, %v344_v12 }
  0x2d   :  { %177 = vperm.xlu0 %2859, %v175_v1   ;;  %v439_v1 = vsub.f32 %v3091_v48, %v4425_v57  ;;  %v4431_v12 = vand.u32 4294901760, %v3131_v58  ;;  %v4432_v13 = vand.u32 4294901760, %v3136_v56  ;;  %v4440_v14 = vand.u32 4294901760, %v3164_v6 }
  0x2e   :  { %2461 = vmatprep.subr.bf16.mxu0 %v3142_v61 }
  0x2f   :  { %v440_v57 = vand.u32 4294901760, %v439_v1  ;;  %v3152_v1 = vsub.f32 %v3124_v16, %v4444_v52  ;;  %2463 = vmatpush3.bf16.msra.mxu0 %v3158_v8  ;;  %v3232_v52 = vpack.c.bf16 %v305_v42, %v302_v41 }
  0x30   :  { %165 = vperm.xlu1 %2857, %v163_v34   ;;  %v559_v34 = vand.u32 4294901760, %v558_v62 }
  0x31   :  { %213 = vperm.xlu0 %2859, %v211_v43   ;;  %v314_v43 = vand.u32 4294901760, %v3122_v5  ;;  %v2502_v9 = vpack.c.bf16 %v447_v51, %v440_v57  ;;  %v4435_v10 = vand.u32 4294901760, %v3152_v1  ;;  %v3173_v51 = vld [vmem:[#allocation2 + $0x48] sm:$0xff]  ;;  %v565_v57 = vsub.f32 %v3131_v58, %v4431_v12 }
  0x32   :  { %v4442_v55 = vand.u32 4294901760, %v3173_v51 }
  0x33   :  { %v3147_v62 = vsub.f32 %v3122_v5, %v314_v43  ;;  %v566_v53 = vand.u32 4294901760, %v565_v57  ;;  %v3214_v57 = vld [vmem:[#allocation2 + $0xd8] sm:$0xff]  ;;  %v3329_v0 = vpack.c.bf16 %v4564_v63, %v314_v43  ;;  %v3346_v63 = vld [vmem:[#allocation2 + $0x70] sm:$0xff] }
  0x34   :  { %2860 = vset.pattern.permute.xlu1 %v2915_v3  ;;  %v2500_v3 = vpack.c.bf16 %v559_v34, %v552_v27  ;;  %v572_v34 = vsub.f32 %v3136_v56, %v4432_v13  ;;  %v3198_v13 = vsub.f32 %v3164_v6, %v4440_v14  ;;  %v3212_v14 = vld [vmem:[#allocation2 + $0xd0] sm:$0xff]  ;;  %v262_v43 = vld [vmem:[#allocation2 + $0xf8] sm:$0xff] }
  0x35   :  { %189 = vperm.xlu1 %2860, %v187_v59   ;;  %v3162_v59 = vld [vmem:[#allocation2 + $0xc0] sm:$0xff]  ;;  %v4434_v27 = vand.u32 4294901760, %v3147_v62  ;;  %4565 = vst [vmem:[#allocation17_spill] sm:$0xff] %v3329_v0 }
  0x36   :  { %2501 = vmatprep.subr.bf16.mxu1 %v2500_v3  ;;  %v4443_v11 = vand.u32 4294901760, %v3162_v59  ;;  %v4441_v3 = vand.u32 4294901760, %v3171_v15  ;;  %v4447_v22 = vand.u32 4294901760, %v3198_v13 }
  0x37   :  { %2503 = vmatpush3.bf16.msra.mxu1 %v2502_v9  ;;  %v453_v54 = vsub.f32 %v3147_v62, %v4434_v27  ;;  %v460_v9 = vsub.f32 %v3152_v1, %v4435_v10  ;;  %v3208_v10 = vsub.f32 %v3173_v51, %v4442_v55 }
  0x38   :  { %v3193_v12 = vsub.f32 %v3162_v59, %v4443_v11  ;;  %v3203_v27 = vsub.f32 %v3171_v15, %v4441_v3  ;;  %v3226_v11 = vld [vmem:[#allocation2 + $0x58] sm:$0xff] }
  0x39   :  { %201 = vperm.xlu1 %2860, %v199_v60   ;;  %v573_v60 = vand.u32 4294901760, %v572_v34  ;;  %v454_v26 = vand.u32 4294901760, %v453_v54  ;;  %v461_v25 = vand.u32 4294901760, %v460_v9  ;;  %v3220_v34 = vpack.c.bf16 %v353_v36, %v350_v35  ;;  %v3224_v9 = vld [vmem:[#allocation2 + $0x50] sm:$0xff] }
  0x3a   :  { %v4448_v23 = vand.u32 4294901760, %v3193_v12  ;;  %v4445_v55 = vand.u32 4294901760, %v3203_v27  ;;  %v4446_v54 = vand.u32 4294901760, %v3208_v10  ;;  %v586_v35 = vsub.f32 %v3198_v13, %v4447_v22  ;;  %v3262_v22 = vld [vmem:[#allocation2 + $0xe0] sm:$0xff] }
  0x3b   :  { %v2504_v3 = vpack.c.bf16 %v573_v60, %v566_v53  ;;  %v2506_v31 = vpack.c.bf16 %v461_v25, %v454_v26  ;;  %2465 = vmatprep.subr.bf16.mxu0 %v3220_v34  ;;  %v4458_v25 = vand.u32 4294901760, %v3212_v14  ;;  %v4449_v26 = vand.u32 4294901760, %v3214_v57 }
  0x3c   :  { %v579_v32 = vsub.f32 %v3193_v12, %v4448_v23  ;;  %v467_v36 = vsub.f32 %v3203_v27, %v4445_v55  ;;  %v474_v37 = vsub.f32 %v3208_v10, %v4446_v54  ;;  %2467 = vmatpush3.bf16.msra.mxu0 %v3232_v52  ;;  %v587_v41 = vand.u32 4294901760, %v586_v35  ;;  %v3282_v23 = vld [vmem:[#allocation2 + $0x60] sm:$0xff] }
  0x3d   :  { %2505 = vmatprep.subr.bf16.mxu1 %v2504_v3  ;;  %v4453_v42 = vand.u32 4294901760, %v3224_v9  ;;  %v4450_v53 = vand.u32 4294901760, %v3226_v11  ;;  %v3255_v55 = vsub.f32 %v3212_v14, %v4458_v25  ;;  %v3260_v54 = vsub.f32 %v3214_v57, %v4449_v26  ;;  %v3284_v26 = vld [vmem:[#allocation2 + $0x68] sm:$0xff] }
  0x3e   :  { %2507 = vmatpush3.bf16.msra.mxu1 %v2506_v31  ;;  %v580_v38 = vand.u32 4294901760, %v579_v32  ;;  %v468_v3 = vand.u32 4294901760, %v467_v36  ;;  %v475_v60 = vand.u32 4294901760, %v474_v37  ;;  %v3264_v31 = vld [vmem:[#allocation2 + $0xe8] sm:$0xff]  ;;  %v3270_v32 = vpack.c.bf16 %v359_v29, %v356_v28 }
  0x3f   :  { %v3275_v36 = vsub.f32 %v3224_v9, %v4453_v42  ;;  %v3280_v37 = vsub.f32 %v3226_v11, %v4450_v53  ;;  %v4452_v28 = vand.u32 4294901760, %v3255_v55  ;;  %v4451_v29 = vand.u32 4294901760, %v3260_v54 }
  0x40   :  { %4561 = vst [vmem:[#allocation14_spill] sm:$0xff] %v3270_v32  ;;  %v2508_v35 = vpack.c.bf16 %v587_v41, %v580_v38  ;;  %v2510_v24 = vpack.c.bf16 %v475_v60, %v468_v3  ;;  %2469 = vmatprep.subr.bf16.mxu0 %v3270_v32  ;;  %v4456_v53 = vand.u32 4294901760, %v3262_v22  ;;  %v4457_v30 = vand.u32 4294901760, %v3264_v31 }
  0x41   :  { %v4455_v38 = vand.u32 4294901760, %v3275_v36  ;;  %v4454_v41 = vand.u32 4294901760, %v3280_v37  ;;  %2471 = vmatpush3.bf16.msra.mxu0 %v3290_v17  ;;  %v593_v33 = vsub.f32 %v3255_v55, %v4452_v28  ;;  %v600_v39 = vsub.f32 %v3260_v54, %v4451_v29 }
  0x42   :  { %2509 = vmatprep.subr.bf16.mxu1 %v2508_v35  ;;  %v4461_v40 = vand.u32 4294901760, %v3282_v23  ;;  %v4460_v3 = vand.u32 4294901760, %v3284_v26  ;;  %v3312_v60 = vpack.c.bf16 %v365_v4, %v362_v7  ;;  %v3323_v29 = vsub.f32 %v3262_v22, %v4456_v53  ;;  %v3336_v4 = vld [vmem:[#allocation2 + $0xf0] sm:$0xff] }
  0x43   :  { %2511 = vmatpush3.bf16.msra.mxu1 %v2510_v24  ;;  %v481_v35 = vsub.f32 %v3275_v36, %v4455_v38  ;;  %v488_v24 = vsub.f32 %v3280_v37, %v4454_v41  ;;  %v594_v28 = vand.u32 4294901760, %v593_v33  ;;  %v601_v42 = vand.u32 4294901760, %v600_v39 }
  0x44   :  { %4563 = vst [vmem:[#allocation16_spill] sm:$0xff] %v3312_v60  ;;  %v3334_v7 = vsub.f32 %v3264_v31, %v4457_v30  ;;  %2473 = vmatprep.subr.bf16.mxu0 %v3312_v60  ;;  %v4566_v33 = vand.u32 4294901760, %v3162_v59  ;;  %v4567_v39 = vand.u32 4294901760, %v3164_v6  ;;  %v4459_v16 = vand.u32 4294901760, %v3323_v29  ;;  %v246_v6 = vld [vmem:[#allocation2 + $0x78] sm:$0xff] }
  0x45   :  { %v482_v41 = vand.u32 4294901760, %v481_v35  ;;  %v489_v38 = vand.u32 4294901760, %v488_v24  ;;  %v2512_v53 = vpack.c.bf16 %v601_v42, %v594_v28  ;;  %2475 = vmatpush3.bf16.msra.mxu0 %v3329_v0  ;;  %v4569_v25 = vand.u32 4294901760, %v3171_v15 }
  0x46   :  { %v3343_v5 = vpack.c.bf16 %v4567_v39, %v4566_v33  ;;  %v4462_v30 = vand.u32 4294901760, %v3334_v7  ;;  %v4570_v35 = vand.u32 4294901760, %v3173_v51  ;;  %v3359_v59 = vsub.f32 %v3282_v23, %v4461_v40 }
  0x47   :  { %v2514_v33 = vpack.c.bf16 %v489_v38, %v482_v41  ;;  %v607_v42 = vsub.f32 %v3323_v29, %v4459_v16  ;;  %v3368_v15 = vsub.f32 %v3284_v26, %v4460_v3  ;;  %v386_v51 = vand.u32 4294901760, %v3336_v4  ;;  %2513 = vmatprep.subr.bf16.mxu1 %v2512_v53 }
  0x48   :  { %4568 = vst [vmem:[#allocation18_spill] sm:$0xff] %v3343_v5  ;;  %v3354_v24 = vpack.c.bf16 %v4570_v35, %v4569_v25  ;;  %2477 = vmatprep.subr.bf16.mxu0 %v3343_v5  ;;  %v614_v25 = vsub.f32 %v3334_v7, %v4462_v30  ;;  %v4471_v28 = vand.u32 4294901760, %v3359_v59  ;;  %v389_v38 = vand.u32 4294901760, %v262_v43 }
  0x49   :  { %v338_v41 = vand.u32 4294901760, %v3346_v63  ;;  %2515 = vmatpush3.bf16.msra.mxu1 %v2514_v33  ;;  %v608_v39 = vand.u32 4294901760, %v607_v42  ;;  %v4472_v35 = vand.u32 4294901760, %v3368_v15  ;;  %v3378_v16 = vsub.f32 %v3336_v4, %v386_v51 }
  0x4a   :  { %4571 = vst [vmem:[#allocation19_spill] sm:$0xff] %v3354_v24  ;;  %v341_v3 = vand.u32 4294901760, %v246_v6  ;;  %v615_v40 = vand.u32 4294901760, %v614_v25  ;;  %2479 = vmatpush3.bf16.msra.mxu0 %v3354_v24  ;;  %v495_v53 = vsub.f32 %v3359_v59, %v4471_v28  ;;  %v3384_v30 = vsub.f32 %v262_v43, %v389_v38 }
  0x4b   :  { %v3387_v5 = vsub.f32 %v3346_v63, %v338_v41  ;;  %v502_v33 = vsub.f32 %v3368_v15, %v4472_v35  ;;  %v4475_v4 = vand.u32 4294901760, %v3378_v16  ;;  %v4572_v35 = vand.u32 4294901760, %v3212_v14 }
  0x4c   :  { %v3393_v42 = vsub.f32 %v246_v6, %v341_v3  ;;  %v2516_v25 = vpack.c.bf16 %v615_v40, %v608_v39  ;;  %v496_v0 = vand.u32 4294901760, %v495_v53  ;;  %v4477_v24 = vand.u32 4294901760, %v3384_v30 }
  0x4d   :  { %v4476_v60 = vand.u32 4294901760, %v3387_v5  ;;  %v503_v28 = vand.u32 4294901760, %v502_v33  ;;  %v621_v43 = vsub.f32 %v3378_v16, %v4475_v4  ;;  %v4573_v17 = vand.u32 4294901760, %v3214_v57 }
  0x4e   :  { %2517 = vmatprep.subr.bf16.mxu1 %v2516_v25  ;;  %v628_v40 = vsub.f32 %v3384_v30, %v4477_v24  ;;  %v4574_v4 = vand.u32 4294901760, %v3224_v9  ;;  %v4575_v25 = vand.u32 4294901760, %v3226_v11  ;;  %v4577_v14 = vand.u32 4294901760, %v3393_v42 }
  0x4f   :  { %v3405_v6 = vpack.c.bf16 %v4573_v17, %v4572_v35  ;;  %v509_v39 = vsub.f32 %v3387_v5, %v4476_v60  ;;  %v2518_v53 = vpack.c.bf16 %v503_v28, %v496_v0  ;;  %v622_v33 = vand.u32 4294901760, %v621_v43 }
  0x50   :  { %v3417_v63 = vpack.c.bf16 %v4575_v25, %v4574_v4  ;;  %v516_v57 = vsub.f32 %v3393_v42, %v4577_v14  ;;  %v629_v17 = vand.u32 4294901760, %v628_v40  ;;  %v4578_v0 = vand.u32 4294901760, %v3262_v22 }
  0x51   :  { %2481 = vmatprep.subr.bf16.mxu0 %v3405_v6  ;;  %v510_v35 = vand.u32 4294901760, %v509_v39  ;;  %2519 = vmatpush3.bf16.msra.mxu1 %v2518_v53  ;;  %v4579_v9 = vand.u32 4294901760, %v3264_v31  ;;  %v4581_v43 = vand.u32 4294901760, %v3282_v23  ;;  %v4582_v25 = vand.u32 4294901760, %v3284_v26  ;;  %v3583_v53 = vld [vmem:[#allocation2 + $0x128] sm:$0xff] }
  0x52   :  { %4576 = vst [vmem:[#allocation20_spill] sm:$0xff] %v3417_v63  ;;  %2483 = vmatpush3.bf16.msra.mxu0 %v3417_v63  ;;  %v517_v60 = vand.u32 4294901760, %v516_v57  ;;  %v2520_v11 = vpack.c.bf16 %v629_v17, %v622_v33  ;;  %v3439_v22 = vpack.c.bf16 %v389_v38, %v386_v51  ;;  %v3442_v31 = vpack.c.bf16 %v341_v3, %v338_v41  ;;  %v3572_v57 = vld [vmem:[#allocation2 + $0x1a8] sm:$0xff]  ;;  %v3581_v33 = vld [vmem:[#allocation2 + $0x120] sm:$0xff]  ;;  %v3592_v38 = vld [vmem:[#allocation2 + $0x1b8] sm:$0xff] }
  0x53   :  { %v3428_v28 = vpack.c.bf16 %v4579_v9, %v4578_v0  ;;  %v3435_v40 = vpack.c.bf16 %v4582_v25, %v4581_v43  ;;  %v2524_v23 = vpack.c.bf16 %v2982_v19, %v2977_v18  ;;  %4588 = vst [vmem:[#allocation25_spill] sm:$0xff] %v3572_v57  ;;  %4590 = vst [vmem:[#allocation27_spill] sm:$0xff] %v3581_v33  ;;  %v3599_v41 = vld [vmem:[#allocation2 + $0x138] sm:$0xff]  ;;  %v4604_v26 = vand.u32 4294901760, %v3583_v53 }
  0x54   :  { %v2522_v4 = vpack.c.bf16 %v517_v60, %v510_v35  ;;  %2521 = vmatprep.subr.bf16.mxu1 %v2520_v11  ;;  %v27_v11 = vlaneseq  ;;  %4591 = vst [vmem:[#allocation28_spill] sm:$0xff] %v3583_v53  ;;  %4593 = vst [vmem:[#allocation30_spill] sm:$0xff] %v3592_v38 }
  0x55   :  { %4580 = vst [vmem:[#allocation21_spill] sm:$0xff] %v3428_v28  ;;  %2485 = vmatprep.subr.bf16.mxu0 %v3428_v28  ;;  %4595 = vst [vmem:[#allocation32_spill] sm:$0xff] %v3599_v41  ;;  %v3628_v60 = vsub.f32 %v3583_v53, %v4604_v26  ;;  %v4620_v26 = vand.u32 4294901760, %v3599_v41 }
  0x56   :  { %2523 = vmatpush3.bf16.msra.mxu1 %v2522_v4  ;;  %2487 = vmatpush3.bf16.msra.mxu0 %v3435_v40  ;;  %v3477_v4 = vand.u32 127, %v27_v11 }
  0x57   :  { %2557 = vmatprep.subr.bf16.mxu1 %v3142_v61  ;;  %2489 = vmatprep.subr.bf16.mxu0 %v3439_v22  ;;  %4605 = vst [vmem:[#allocation36_spill] sm:$0xff] %v3628_v60 }
  0x58   :  { %v3483_v24 = vadd.s32 256, %v3477_v4  ;;  %v3487_v17 = vadd.s32 384, %v3477_v4 }
  0x5a   :  { %2491 = vmatpush3.bf16.msra.mxu0 %v3442_v31 }
  0x5b   :  { %2525 = vmatprep.subr.bf16.mxu0 %v2524_v23  ;;  %v3480_v23 = vadd.s32 128, %v3477_v4 }
  0x95   :  { %v70_v43 = vpop.permute.xlu1 %69  ;;  %v35_v25 = vpop.permute.xlu0 %34 }
  0x96   :  { %vm36_vm0 = vcmp.eq.s32.totalorder %v35_v25, %v3477_v4  ;;  %vm37_vm1 = vcmp.eq.s32.totalorder %v35_v25, %v3480_v23  ;;  %vm38_vm2 = vcmp.eq.s32.totalorder %v35_v25, %v3483_v24  ;;  %vm39_vm6 = vcmp.eq.s32.totalorder %v35_v25, %v3487_v17 }
  0x99   :  { %v44_v35 = vpop.permute.xlu0 %43  ;;  %v57_v9 = vpop.permute.xlu1 %56 }
  0x9a   :  { %vm45_vm3 = vcmp.eq.s32.totalorder %v44_v35, %v3477_v4  ;;  %vm46_vm4 = vcmp.eq.s32.totalorder %v44_v35, %v3480_v23  ;;  %vm47_vm5 = vcmp.eq.s32.totalorder %v44_v35, %v3483_v24  ;;  %vm48_vm7 = vcmp.eq.s32.totalorder %v44_v35, %v3487_v17 }
  0x9b   :  { %vm49_vm8 = vmor %vm36_vm0, %vm45_vm3  ;;  %vm58_vm9 = vcmp.eq.s32.totalorder %v57_v9, %v3477_v4  ;;  %vm59_vm11 = vcmp.eq.s32.totalorder %v57_v9, %v3480_v23  ;;  %vm60_vm13 = vcmp.eq.s32.totalorder %v57_v9, %v3483_v24  ;;  %vm61_vm15 = vcmp.eq.s32.totalorder %v57_v9, %v3487_v17 }
  0x9c   :  { %vm50_vm10 = vmor %vm37_vm1, %vm46_vm4  ;;  %vm71_vm4 = vcmp.eq.s32.totalorder %v70_v43, %v3477_v4 }
  0x9d   :  { %vm51_vm12 = vmor %vm38_vm2, %vm47_vm5  ;;  %vm72_vm5 = vcmp.eq.s32.totalorder %v70_v43, %v3480_v23 }
  0x9e   :  { %vm52_vm14 = vmor %vm39_vm6, %vm48_vm7  ;;  %v82_v11 = vpop.permute.xlu0 %81  ;;  %v94_v35 = vpop.permute.xlu1 %93  ;;  %vm73_vm7 = vcmp.eq.s32.totalorder %v70_v43, %v3483_v24 }
  0x9f   :  { %vm62_vm0 = vmor %vm49_vm8, %vm58_vm9  ;;  %vm83_vm9 = vcmp.eq.s32.totalorder %v82_v11, %v3477_v4 }
  0xa0   :  { %vm63_vm3 = vmor %vm50_vm10, %vm59_vm11  ;;  %vm74_vm10 = vcmp.eq.s32.totalorder %v70_v43, %v3487_v17 }
  0xa1   :  { %vm64_vm1 = vmor %vm51_vm12, %vm60_vm13  ;;  %vm84_vm12 = vcmp.eq.s32.totalorder %v82_v11, %v3480_v23 }
  0xa2   :  { %vm65_vm2 = vmor %vm52_vm14, %vm61_vm15  ;;  %vm85_vm14 = vcmp.eq.s32.totalorder %v82_v11, %v3483_v24  ;;  %vm86_vm15 = vcmp.eq.s32.totalorder %v82_v11, %v3487_v17  ;;  %v106_v9 = vpop.permute.xlu1 %105  ;;  %v118_v43 = vpop.permute.xlu0 %117 }
  0xa3   :  { %vm75_vm6 = vmor %vm62_vm0, %vm71_vm4  ;;  %vm95_vm4 = vcmp.eq.s32.totalorder %v94_v35, %v3477_v4 }
  0xa4   :  { %vm76_vm8 = vmor %vm63_vm3, %vm72_vm5  ;;  %vm96_vm5 = vcmp.eq.s32.totalorder %v94_v35, %v3480_v23 }
  0xa5   :  { %vm77_vm11 = vmor %vm64_vm1, %vm73_vm7  ;;  %vm97_vm7 = vcmp.eq.s32.totalorder %v94_v35, %v3483_v24 }
  0xa6   :  { %vm78_vm13 = vmor %vm65_vm2, %vm74_vm10  ;;  %vm98_vm10 = vcmp.eq.s32.totalorder %v94_v35, %v3487_v17 }
  0xa7   :  { %vm87_vm0 = vmor %vm75_vm6, %vm83_vm9  ;;  %v130_v25 = vpop.permute.xlu1 %129  ;;  %v142_v11 = vpop.permute.xlu0 %141 }
  0xa8   :  { %vm88_vm3 = vmor %vm76_vm8, %vm84_vm12  ;;  %vm107_vm8 = vcmp.eq.s32.totalorder %v106_v9, %v3477_v4 }
  0xa9   :  { %vm89_vm1 = vmor %vm77_vm11, %vm85_vm14  ;;  %vm108_vm11 = vcmp.eq.s32.totalorder %v106_v9, %v3480_v23 }
  0xaa   :  { %vm90_vm2 = vmor %vm78_vm13, %vm86_vm15  ;;  %vm109_vm13 = vcmp.eq.s32.totalorder %v106_v9, %v3483_v24  ;;  %vm110_vm15 = vcmp.eq.s32.totalorder %v106_v9, %v3487_v17 }
  0xab   :  { %vm99_vm6 = vmor %vm87_vm0, %vm95_vm4  ;;  %v154_v35 = vpop.permute.xlu1 %153 }
  0xac   :  { %vm100_vm9 = vmor %vm88_vm3, %vm96_vm5  ;;  %vm119_vm3 = vcmp.eq.s32.totalorder %v118_v43, %v3477_v4 }
  0xad   :  { %vm101_vm12 = vmor %vm89_vm1, %vm97_vm7  ;;  %vm120_vm1 = vcmp.eq.s32.totalorder %v118_v43, %v3480_v23 }
  0xae   :  { %vm102_vm14 = vmor %vm90_vm2, %vm98_vm10  ;;  %vm121_vm2 = vcmp.eq.s32.totalorder %v118_v43, %v3483_v24  ;;  %vm122_vm10 = vcmp.eq.s32.totalorder %v118_v43, %v3487_v17  ;;  %v178_v43 = vpop.permute.xlu0 %177 }
  0xaf   :  { %vm111_vm0 = vmor %vm99_vm6, %vm107_vm8  ;;  %v166_v9 = vpop.permute.xlu1 %165 }
  0xb0   :  { %vm112_vm4 = vmor %vm100_vm9, %vm108_vm11  ;;  %vm131_vm9 = vcmp.eq.s32.totalorder %v130_v25, %v3477_v4 }
  0xb1   :  { %vm113_vm5 = vmor %vm101_vm12, %vm109_vm13  ;;  %vm132_vm12 = vcmp.eq.s32.totalorder %v130_v25, %v3480_v23 }
  0xb2   :  { %vm114_vm7 = vmor %vm102_vm14, %vm110_vm15  ;;  %vm133_vm14 = vcmp.eq.s32.totalorder %v130_v25, %v3483_v24  ;;  %vm134_vm15 = vcmp.eq.s32.totalorder %v130_v25, %v3487_v17 }
  0xb3   :  { %vm123_vm6 = vmor %vm111_vm0, %vm119_vm3 }
  0xb4   :  { %vm124_vm8 = vmor %vm112_vm4, %vm120_vm1  ;;  %vm143_vm1 = vcmp.eq.s32.totalorder %v142_v11, %v3477_v4  ;;  %v190_v25 = vpop.permute.xlu1 %189 }
  0xb5   :  { %vm125_vm11 = vmor %vm113_vm5, %vm121_vm2  ;;  %vm144_vm2 = vcmp.eq.s32.totalorder %v142_v11, %v3480_v23 }
  0xb6   :  { %vm126_vm13 = vmor %vm114_vm7, %vm122_vm10  ;;  %vm145_vm7 = vcmp.eq.s32.totalorder %v142_v11, %v3483_v24  ;;  %vm146_vm10 = vcmp.eq.s32.totalorder %v142_v11, %v3487_v17 }
  0xb7   :  { %vm135_vm0 = vmor %vm123_vm6, %vm131_vm9 }
  0xb8   :  { %vm136_vm3 = vmor %vm124_vm8, %vm132_vm12  ;;  %vm155_vm8 = vcmp.eq.s32.totalorder %v154_v35, %v3477_v4  ;;  %v202_v11 = vpop.permute.xlu1 %201 }
  0xb9   :  { %vm137_vm4 = vmor %vm125_vm11, %vm133_vm14  ;;  %vm156_vm11 = vcmp.eq.s32.totalorder %v154_v35, %v3480_v23 }
  0xba   :  { %vm138_vm5 = vmor %vm126_vm13, %vm134_vm15  ;;  %vm157_vm13 = vcmp.eq.s32.totalorder %v154_v35, %v3483_v24  ;;  %vm158_vm15 = vcmp.eq.s32.totalorder %v154_v35, %v3487_v17  ;;  %v214_v35 = vpop.permute.xlu0 %213 }
  0xbb   :  { %vm147_vm6 = vmor %vm135_vm0, %vm143_vm1 }
  0xbc   :  { %vm148_vm9 = vmor %vm136_vm3, %vm144_vm2  ;;  %vm167_vm2 = vcmp.eq.s32.totalorder %v166_v9, %v3477_v4 }
  0xbd   :  { %vm149_vm12 = vmor %vm137_vm4, %vm145_vm7  ;;  %vm168_vm4 = vcmp.eq.s32.totalorder %v166_v9, %v3480_v23 }
  0xbe   :  { %vm150_vm14 = vmor %vm138_vm5, %vm146_vm10  ;;  %vm169_vm5 = vcmp.eq.s32.totalorder %v166_v9, %v3483_v24  ;;  %vm170_vm10 = vcmp.eq.s32.totalorder %v166_v9, %v3487_v17 }
  0xbf   :  { %vm159_vm0 = vmor %vm147_vm6, %vm155_vm8 }
  0xc0   :  { %vm160_vm1 = vmor %vm148_vm9, %vm156_vm11  ;;  %vm179_vm9 = vcmp.eq.s32.totalorder %v178_v43, %v3477_v4 }
  0xc1   :  { %vm161_vm3 = vmor %vm149_vm12, %vm157_vm13  ;;  %vm180_vm12 = vcmp.eq.s32.totalorder %v178_v43, %v3480_v23 }
  0xc2   :  { %vm162_vm7 = vmor %vm150_vm14, %vm158_vm15  ;;  %vm181_vm14 = vcmp.eq.s32.totalorder %v178_v43, %v3483_v24  ;;  %vm182_vm15 = vcmp.eq.s32.totalorder %v178_v43, %v3487_v17  ;;  %v2916_v43 = vmov 0.0  }
  0xc3   :  { %vm171_vm6 = vmor %vm159_vm0, %vm167_vm2  ;;  %vm191_vm2 = vcmp.eq.s32.totalorder %v190_v25, %v3477_v4 }
  0xc4   :  { %vm172_vm8 = vmor %vm160_vm1, %vm168_vm4  ;;  %vm192_vm4 = vcmp.eq.s32.totalorder %v190_v25, %v3480_v23 }
  0xc5   :  { %vm173_vm11 = vmor %vm161_vm3, %vm169_vm5  ;;  %vm193_vm5 = vcmp.eq.s32.totalorder %v190_v25, %v3483_v24 }
  0xc6   :  { %vm174_vm13 = vmor %vm162_vm7, %vm170_vm10  ;;  %vm194_vm10 = vcmp.eq.s32.totalorder %v190_v25, %v3487_v17 }
  0xc7   :  { %vm183_vm0 = vmor %vm171_vm6, %vm179_vm9 }
  0xc8   :  { %vm184_vm1 = vmor %vm172_vm8, %vm180_vm12  ;;  %vm203_vm8 = vcmp.eq.s32.totalorder %v202_v11, %v3477_v4 }
  0xc9   :  { %vm185_vm3 = vmor %vm173_vm11, %vm181_vm14  ;;  %vm204_vm11 = vcmp.eq.s32.totalorder %v202_v11, %v3480_v23 }
  0xca   :  { %vm186_vm7 = vmor %vm174_vm13, %vm182_vm15  ;;  %vm205_vm13 = vcmp.eq.s32.totalorder %v202_v11, %v3483_v24  ;;  %vm206_vm15 = vcmp.eq.s32.totalorder %v202_v11, %v3487_v17 }
  0xcb   :  { %vm195_vm6 = vmor %vm183_vm0, %vm191_vm2 }
  0xcc   :  { %vm196_vm9 = vmor %vm184_vm1, %vm192_vm4  ;;  %vm216_vm4 = vcmp.eq.s32.totalorder %v214_v35, %v3480_v23  ;;  %v3570_v23 = vld [vmem:[#allocation2 + $0x1a0] sm:$0xff] }
  0xcd   :  { %vm197_vm12 = vmor %vm185_vm3, %vm193_vm5  ;;  %vm215_vm5 = vcmp.eq.s32.totalorder %v214_v35, %v3477_v4  ;;  %4587 = vst [vmem:[#allocation24_spill] sm:$0xff] %v3570_v23 }
  0xce   :  { %vm198_vm14 = vmor %vm186_vm7, %vm194_vm10  ;;  %vm218_vm10 = vcmp.eq.s32.totalorder %v214_v35, %v3487_v17 }
  0xcf   :  { %vm207_vm0 = vmor %vm195_vm6, %vm203_vm8  ;;  %vm217_vm8 = vcmp.eq.s32.totalorder %v214_v35, %v3483_v24 }
  0xd0   :  { %vm208_vm2 = vmor %vm196_vm9, %vm204_vm11 }
  0xd1   :  { %vm3548_vm1 = vmor %vm197_vm12, %vm205_vm13 }
  0xd2   :  { %vm210_vm3 = vmor %vm198_vm14, %vm206_vm15 }
  0xd3   :  { %vm220_vm7 = vmor %vm208_vm2, %vm216_vm4 }
  0xd4   :  { %v3555_v25 = vsel %vm220_vm7, 1.0, %v2916_v43  ;;  %vm219_vm6 = vmor %vm207_vm0, %vm215_vm5 }
  0xd5   :  { %v392_v11 = vsub.f32 %v3555_v25, %v3555_v25  ;;  %632 = vmatprep.mubr.f32.mxu1 %v3555_v25  ;;  %v3561_v0 = vsel %vm219_vm6, 1.0, %v2916_v43  ;;  %vm222_vm9 = vmor %vm210_vm3, %vm218_vm10 }
  0xd6   :  { %4585 = vst [vmem:[#allocation22_spill] sm:$0xff] %v3561_v0  ;;  %v3565_v4 = vsub.f32 %v3561_v0, %v3561_v0  ;;  %634 = vmatmul.mubr.f32.vlgmr.msra.gmra.mrb[0].mxu1 %v3561_v0  ;;  %v3568_v17 = vsel %vm222_vm9, 1.0, %v2916_v43  ;;  %vm221_vm12 = vmor %vm3548_vm1, %vm217_vm8  ;;  %v4598_v0 = vand.u32 4294901760, %v3572_v57 }
  0xd7   :  { %4586 = vst [vmem:[#allocation23_spill] sm:$0xff] %v3568_v17  ;;  %2559 = vmatpush3.bf16.msra.mxu1 %v3158_v8  ;;  %v393_v24 = vand.u32 4294901760, %v392_v11  ;;  %v3577_v35 = vsel %vm221_vm12, 1.0, %v2916_v43  ;;  %v3590_v43 = vld [vmem:[#allocation2 + $0x1b0] sm:$0xff]  ;;  %v3632_v17 = vld [vmem:[#allocation2 + $0x1c8] sm:$0xff] }
  0xd8   :  { %4589 = vst [vmem:[#allocation26_spill] sm:$0xff] %v3577_v35  ;;  %2561 = vmatprep.subr.bf16.mxu1 %v3220_v34  ;;  %v4478_v14 = vand.u32 4294901760, %v3565_v4  ;;  %4592 = vst [vmem:[#allocation29_spill] sm:$0xff] %v3590_v43  ;;  %v4612_v53 = vand.u32 4294901760, %v3590_v43 }
  0xd9   :  { %876 = vmatprep.mubr.f32.mxu1 %v393_v24  ;;  %v394_v39 = vsub.f32 %v392_v11, %v393_v24  ;;  %v3597_v24 = vld [vmem:[#allocation2 + $0x130] sm:$0xff]  ;;  %4607 = vst [vmem:[#allocation38_spill] sm:$0xff] %v3632_v17 }
  0xda   :  { %v400_v3 = vsub.f32 %v3565_v4, %v4478_v14  ;;  %4594 = vst [vmem:[#allocation31_spill] sm:$0xff] %v3597_v24  ;;  %v4596_v14 = vand.u32 4294901760, %v3570_v23 }
  0xdb   :  { %2563 = vmatpush3.bf16.msra.mxu1 %v3232_v52  ;;  %v395_v51 = vand.u32 4294901760, %v394_v39  ;;  %v3610_v39 = vsub.f32 %v3572_v57, %v4598_v0  ;;  %v3639_v57 = vld [vmem:[#allocation2 + $0x148] sm:$0xff] }
  0xdc   :  { %2565 = vmatprep.subr.bf16.mxu1 %v3270_v32  ;;  %v401_v9 = vand.u32 4294901760, %v400_v3  ;;  %v3605_v35 = vsub.f32 %v3570_v23, %v4596_v14  ;;  %v4601_v14 = vld [vmem:[#allocation15_spill] sm:$0xff]  ;;  %v4602_v23 = vand.u32 4294901760, %v3581_v33  ;;  %4610 = vst [vmem:[#allocation40_spill] sm:$0xff] %v3639_v57  ;;  %v3666_v32 = vsub.f32 %v3599_v41, %v4620_v26  ;;  %v3684_v41 = vld [vmem:[#allocation2 + $0x150] sm:$0xff] }
  0xdd   :  { %396 = vmatprep.mubr.f32.mxu0 %v395_v51  ;;  %4599 = vst [vmem:[#allocation34_spill] sm:$0xff] %v3610_v39  ;;  %v4600_v51 = vpack.c.bf16 %v2992_v21, %v2987_v20  ;;  %v3637_v3 = vld [vmem:[#allocation2 + $0x140] sm:$0xff]  ;;  %v4624_v26 = vpack.c.bf16 %v3086_v47, %v3081_v44  ;;  %4626 = vst [vmem:[#allocation47_spill] sm:$0xff] %v3684_v41 }
  0xde   :  { %4597 = vst [vmem:[#allocation33_spill] sm:$0xff] %v3605_v35  ;;  %402 = vmatmul.mubr.f32.vlgmr.msra.gmra.mrb[0].mxu0 %v401_v9  ;;  %v3623_v0 = vsub.f32 %v3581_v33, %v4602_v23  ;;  %v3630_v9 = vld [vmem:[#allocation2 + $0x1c0] sm:$0xff]  ;;  %4609 = vst [vmem:[#allocation39_spill] sm:$0xff] %v3637_v3  ;;  %v4611_v23 = vld [vmem:[#allocation16_spill] sm:$0xff] }
  0xdf   :  { %2527 = vmatpush3.bf16.msra.mxu0 %v4600_v51  ;;  %2567 = vmatpush3.bf16.msra.mxu1 %v4601_v14  ;;  %4606 = vst [vmem:[#allocation37_spill] sm:$0xff] %v3630_v9  ;;  %v4608_v51 = vpack.c.bf16 %v3032_v46, %v3027_v45  ;;  %v3647_v14 = vsub.f32 %v3590_v43, %v4612_v53  ;;  %v3656_v45 = vld [vmem:[#allocation2 + $0x1d8] sm:$0xff]  ;;  %4621 = vst [vmem:[#allocation46_spill] sm:$0xff] %v3666_v32  ;;  %v4632_v43 = vand.u32 4294901760, %v3628_v60 }
  0xe0   :  { %4603 = vst [vmem:[#allocation35_spill] sm:$0xff] %v3623_v0  ;;  %769 = vmatprep.mubr.f32.mxu0 %v392_v11  ;;  %2569 = vmatprep.subr.bf16.mxu1 %v4611_v23  ;;  %v4614_v11 = vand.u32 4294901760, %v3592_v38  ;;  %4617 = vst [vmem:[#allocation44_spill] sm:$0xff] %v3656_v45  ;;  %v4618_v23 = vand.u32 4294901760, %v3597_v24  ;;  %v4625_v53 = vld [vmem:[#allocation18_spill] sm:$0xff] }
  0xe1   :  { %2529 = vmatprep.subr.bf16.mxu0 %v4608_v51  ;;  %4613 = vst [vmem:[#allocation41_spill] sm:$0xff] %v3647_v14  ;;  %v3654_v51 = vld [vmem:[#allocation2 + $0x1d0] sm:$0xff] }
  0xe2   :  { %v3652_v46 = vsub.f32 %v3592_v38, %v4614_v11  ;;  %4616 = vst [vmem:[#allocation43_spill] sm:$0xff] %v3654_v51  ;;  %v3661_v33 = vsub.f32 %v3597_v24, %v4618_v23  ;;  %v4622_v11 = vpack.c.bf16 %v3043_v50, %v3038_v49  ;;  %v4623_v38 = vld [vmem:[#allocation17_spill] sm:$0xff]  ;;  %v4628_v23 = vand.u32 4294901760, %v3605_v35 }
  0xe3   :  { %2571 = vmatpush3.bf16.msra.mxu1 %v4623_v38  ;;  %v3686_v38 = vld [vmem:[#allocation2 + $0x158] sm:$0xff]  ;;  %v4629_v24 = vand.u32 4294901760, %v3610_v39  ;;  %v4634_v35 = vand.u32 4294901760, %v3630_v9 }
  0xe4   :  { %4615 = vst [vmem:[#allocation42_spill] sm:$0xff] %v3652_v46  ;;  %4619 = vst [vmem:[#allocation45_spill] sm:$0xff] %v3661_v33  ;;  %2531 = vmatpush3.bf16.msra.mxu0 %v4622_v11  ;;  %2573 = vmatprep.subr.bf16.mxu1 %v4625_v53  ;;  %v4631_v53 = vand.u32 4294901760, %v3623_v0  ;;  %v4639_v11 = vand.u32 4294901760, %v3639_v57  ;;  %v4650_v60 = vand.u32 4294901760, %v3661_v33  ;;  %v4669_v33 = vpack.c.bf16 %v3208_v10, %v3203_v27 }
  0xe5   :  { %2533 = vmatprep.subr.bf16.mxu0 %v4624_v26  ;;  %4627 = vst [vmem:[#allocation48_spill] sm:$0xff] %v3686_v38  ;;  %v3692_v21 = vpack.c.bf16 %v4629_v24, %v4628_v23  ;;  %v3707_v39 = vsub.f32 %v3630_v9, %v4634_v35  ;;  %v4635_v24 = vand.u32 4294901760, %v3632_v17  ;;  %v4636_v26 = vpack.c.bf16 %v3096_v2, %v3091_v48  ;;  %v3754_v9 = vld [vmem:[#allocation2 + $0x160] sm:$0xff] }
  0xe6   :  { %v3700_v47 = vpack.c.bf16 %v4632_v43, %v4631_v53  ;;  %v4637_v43 = vld [vmem:[#allocation19_spill] sm:$0xff]  ;;  %v4638_v53 = vand.u32 4294901760, %v3637_v3  ;;  %v3726_v35 = vsub.f32 %v3639_v57, %v4639_v11  ;;  %v4644_v11 = vand.u32 4294901760, %v3656_v45  ;;  %4648 = vst [vmem:[#allocation53_spill] sm:$0xff] %v3754_v9 }
  0xe7   :  { %4630 = vst [vmem:[#allocation49_spill] sm:$0xff] %v3692_v21  ;;  %v3712_v23 = vsub.f32 %v3632_v17, %v4635_v24  ;;  %2575 = vmatpush3.bf16.msra.mxu1 %v4637_v43  ;;  %v3732_v21 = vld [vmem:[#allocation2 + $0x1e8] sm:$0xff]  ;;  %v4645_v24 = vand.u32 4294901760, %v3647_v14  ;;  %v4646_v57 = vand.u32 4294901760, %v3652_v46  ;;  %v4657_v46 = vand.u32 4294901760, %v3686_v38 }
  0xe8   :  { %4633 = vst [vmem:[#allocation50_spill] sm:$0xff] %v3700_v47  ;;  %2535 = vmatpush3.bf16.msra.mxu0 %v4636_v26  ;;  %v3721_v44 = vsub.f32 %v3637_v3, %v4638_v53  ;;  %v3730_v47 = vld [vmem:[#allocation2 + $0x1e0] sm:$0xff]  ;;  %4641 = vst [vmem:[#allocation51_spill] sm:$0xff] %v3732_v21  ;;  %v4642_v26 = vpack.c.bf16 %v3136_v56, %v3131_v58  ;;  %2577 = vmatprep.subr.bf16.mxu1 %v3405_v6  ;;  %v4643_v53 = vand.u32 4294901760, %v3654_v51 }
  0xe9   :  { %4640 = vst [vmem:[#allocation19_spill] sm:$0xff] %v3730_v47  ;;  %v3746_v20 = vsub.f32 %v3656_v45, %v4644_v11  ;;  %v3752_v17 = vpack.c.bf16 %v4646_v57, %v4645_v24  ;;  %v3768_v57 = vld [vmem:[#allocation2 + $0x1f0] sm:$0xff]  ;;  %v3770_v24 = vld [vmem:[#allocation2 + $0x1f8] sm:$0xff]  ;;  %v4656_v11 = vand.u32 4294901760, %v3684_v41  ;;  %v3786_v0 = vsub.f32 %v3686_v38, %v4657_v46 }
  0xea   :  { %2537 = vmatprep.subr.bf16.mxu0 %v4642_v26  ;;  %v3741_v3 = vsub.f32 %v3654_v51, %v4643_v53  ;;  %v3756_v26 = vld [vmem:[#allocation2 + $0x168] sm:$0xff]  ;;  %v4651_v53 = vand.u32 4294901760, %v3666_v32  ;;  %4653 = vst [vmem:[#allocation56_spill] sm:$0xff] %v3768_v57  ;;  %4654 = vst [vmem:[#allocation57_spill] sm:$0xff] %v3770_v24  ;;  %v3790_v32 = vld [vmem:[#allocation2 + $0x178] sm:$0xff]  ;;  %v4662_v46 = vand.u32 4294901760, %v3712_v23 }
  0xeb   :  { %4647 = vst [vmem:[#allocation52_spill] sm:$0xff] %v3752_v17  ;;  %4649 = vst [vmem:[#allocation54_spill] sm:$0xff] %v3756_v26  ;;  %v4655_v17 = vpack.c.bf16 %v3152_v1, %v3147_v62  ;;  %2579 = vmatpush3.bf16.msra.mxu1 %v3417_v63  ;;  %v3781_v45 = vsub.f32 %v3684_v41, %v4656_v11  ;;  %v4661_v41 = vand.u32 4294901760, %v3707_v39  ;;  %v4667_v11 = vand.u32 4294901760, %v3730_v47 }
  0xec   :  { %v3762_v51 = vpack.c.bf16 %v4651_v53, %v4650_v60  ;;  %4659 = vst [vmem:[#allocation59_spill] sm:$0xff] %v3790_v32  ;;  %2581 = vmatprep.subr.bf16.mxu1 %v3428_v28  ;;  %v4664_v28 = vand.u32 4294901760, %v3721_v44  ;;  %v4665_v53 = vand.u32 4294901760, %v3726_v35  ;;  %v4672_v14 = vand.u32 4294901760, %v3741_v3 }
  0xed   :  { %2539 = vmatpush3.bf16.msra.mxu0 %v4655_v17  ;;  %v4660_v17 = vpack.c.bf16 %v3198_v13, %v3193_v12  ;;  %v3803_v38 = vpack.c.bf16 %v4662_v46, %v4661_v41  ;;  %v3817_v60 = vsub.f32 %v3730_v47, %v4667_v11  ;;  %v4668_v41 = vand.u32 4294901760, %v3732_v21  ;;  %v4718_v47 = vld [vmem:[#allocation17_spill] sm:$0xff] }
  0xee   :  { %4652 = vst [vmem:[#allocation55_spill] sm:$0xff] %v3762_v51  ;;  %v3788_v51 = vld [vmem:[#allocation2 + $0x170] sm:$0xff]  ;;  %v3812_v63 = vpack.c.bf16 %v4665_v53, %v4664_v28  ;;  %v4670_v11 = vpack.c.bf16 %v3260_v54, %v3255_v55  ;;  %v4675_v28 = vand.u32 4294901760, %v3756_v26 }
  0xef   :  { %4658 = vst [vmem:[#allocation58_spill] sm:$0xff] %v3788_v51  ;;  %2541 = vmatprep.subr.bf16.mxu0 %v4660_v17  ;;  %4663 = vst [vmem:[#allocation60_spill] sm:$0xff] %v3803_v38  ;;  %v3822_v46 = vsub.f32 %v3732_v21, %v4668_v41  ;;  %2583 = vmatpush3.bf16.msra.mxu1 %v3435_v40  ;;  %v4671_v41 = vand.u32 4294901760, %v3754_v9  ;;  %v4677_v21 = vand.u32 4294901760, %v3770_v24 }
  0xf0   :  { %4666 = vst [vmem:[#allocation61_spill] sm:$0xff] %v3812_v63  ;;  %2585 = vmatprep.subr.bf16.mxu1 %v3439_v22  ;;  %v3850_v53 = vsub.f32 %v3756_v26, %v4675_v28  ;;  %v4681_v26 = vand.u32 4294901760, %v3788_v51 }
  0xf1   :  { %2543 = vmatpush3.bf16.msra.mxu0 %v4669_v33  ;;  %v3839_v17 = vsub.f32 %v3754_v9, %v4671_v41  ;;  %v4673_v33 = vand.u32 4294901760, %v3746_v20  ;;  %v3860_v41 = vsub.f32 %v3770_v24, %v4677_v21  ;;  %v4678_v9 = vand.u32 4294901760, %v3781_v45 }
  0xf2   :  { %2545 = vmatprep.subr.bf16.mxu0 %v4670_v11  ;;  %v4676_v11 = vand.u32 4294901760, %v3768_v57  ;;  %v4531_v28 = vand.u32 4294901760, %v3822_v46  ;;  %v4684_v24 = vpack.c.bf16 %v3280_v37, %v3275_v36 }
  0xf3   :  { %v3845_v63 = vpack.c.bf16 %v4673_v33, %v4672_v14  ;;  %v4679_v14 = vand.u32 4294901760, %v3786_v0  ;;  %2587 = vmatpush3.bf16.msra.mxu1 %v3442_v31 }
  0xf4   :  { %v3855_v38 = vsub.f32 %v3768_v57, %v4676_v11  ;;  %v3873_v11 = vsub.f32 %v3788_v51, %v4681_v26  ;;  %v4682_v57 = vand.u32 4294901760, %v3790_v32  ;;  %2621 = vmatprep.subr.bf16.mxu1 %v3142_v61  ;;  %v4688_v51 = vpack.c.bf16 %v3368_v15, %v3359_v59 }
  0xf5   :  { %4674 = vst [vmem:[#allocation62_spill] sm:$0xff] %v3845_v63  ;;  %v3866_v33 = vpack.c.bf16 %v4679_v14, %v4678_v9  ;;  %v4532_v63 = vand.u32 4294901760, %v3817_v60  ;;  %2547 = vmatpush3.bf16.msra.mxu0 %v4684_v24  ;;  %v4685_v9 = vpack.c.bf16 %v3334_v7, %v3323_v29  ;;  %v4533_v14 = vand.u32 4294901760, %v3850_v53 }
  0xf6   :  { %v3878_v21 = vsub.f32 %v3790_v32, %v4682_v57  ;;  %v4534_v57 = vand.u32 4294901760, %v3839_v17  ;;  %v4536_v24 = vand.u32 4294901760, %v3855_v38  ;;  %v4687_v32 = vand.u32 4294901760, %v3565_v4 }
  0xf7   :  { %4680 = vst [vmem:[#allocation63_spill] sm:$0xff] %v3866_v33  ;;  %2549 = vmatprep.subr.bf16.mxu0 %v4685_v9  ;;  %v3892_v26 = vpack.c.bf16 %v4531_v28, %v4532_v63  ;;  %v4535_v33 = vand.u32 4294901760, %v3860_v41  ;;  %v4537_v9 = vand.u32 4294901760, %v3873_v11  ;;  %v4691_v63 = vpack.c.bf16 %v3384_v30, %v3378_v16 }
  0xf8   :  { %4683 = vst [vmem:[#allocation64_spill] sm:$0xff] %v3878_v21  ;;  %880 = vmatmul.mubr.f32.vlgmr.msra.gmra.mrb[2].mxu1 %v4687_v32  ;;  %v3910_v28 = vpack.c.bf16 %v4533_v14, %v4534_v57  ;;  %v4694_v14 = vand.u32 4294901760, %v3878_v21  ;;  %v4720_v21 = vand.u32 4294901760, %v3136_v56 }
  0xf9   :  { %4686 = vst [vmem:[#allocation65_spill] sm:$0xff] %v3892_v26  ;;  %2551 = vmatpush3.bf16.msra.mxu0 %v4688_v51  ;;  %2623 = vmatpush3.bf16.msra.mxu1 %v3158_v8  ;;  %v3916_v32 = vpack.c.bf16 %v4535_v33, %v4536_v24  ;;  %v4692_v8 = vand.u32 4294901760, %v2977_v18  ;;  %v4693_v51 = vand.u32 4294901760, %v2982_v19  ;;  %v3933_v33 = vld [vmem:[#allocation2 + $0x180] sm:$0xff]  ;;  %v3935_v24 = vld [vmem:[#allocation2 + $0x188] sm:$0xff] }
  0xfa   :  { %4689 = vst [vmem:[#allocation66_spill] sm:$0xff] %v3910_v28  ;;  %1150 = vmatprep.mubr.f32.mxu1 %v3555_v25  ;;  %2553 = vmatprep.subr.bf16.mxu0 %v4691_v63  ;;  %v3930_v57 = vpack.c.bf16 %v4694_v14, %v4537_v9  ;;  %v4696_v63 = vpack.c.bf16 %v3393_v42, %v3387_v5  ;;  %v4697_v18 = vld [vmem:[#allocation8_spill] sm:$0xff]  ;;  %v4701_v14 = vld [vmem:[#allocation14_spill] sm:$0xff] }
  0xfb   :  { %4690 = vst [vmem:[#allocation67_spill] sm:$0xff] %v3916_v32  ;;  %v2588_v61 = vpack.c.bf16 %v4693_v51, %v4692_v8  ;;  %2625 = vmatprep.subr.bf16.mxu1 %v3220_v34  ;;  %v4698_v19 = vand.u32 4294901760, %v4697_v18  ;;  %v4699_v8 = vld [vmem:[#allocation9_spill] sm:$0xff]  ;;  %v4702_v9 = vld [vmem:[#allocation10_spill] sm:$0xff] }
  0xfc   :  { %4695 = vst [vmem:[#allocation68_spill] sm:$0xff] %v3930_v57  ;;  %v4700_v51 = vand.u32 4294901760, %v4699_v8  ;;  %v4703_v34 = vand.u32 4294901760, %v4702_v9  ;;  %v4704_v57 = vld [vmem:[#allocation11_spill] sm:$0xff]  ;;  %v3957_v18 = vld [vmem:[#allocation2 + $0x190] sm:$0xff]  ;;  %v4709_v8 = vld [vmem:[#allocation12_spill] sm:$0xff] }
  0xfd   :  { %2555 = vmatpush3.bf16.msra.mxu0 %v4696_v63  ;;  %2627 = vmatpush3.bf16.msra.mxu1 %v3232_v52  ;;  %v4705_v28 = vand.u32 4294901760, %v4704_v57  ;;  %v3952_v63 = vld [vmem:[#allocation2 + $0x100] sm:$0xff]  ;;  %v3954_v52 = vld [vmem:[#allocation2 + $0x108] sm:$0xff]  ;;  %v4706_v57 = vand.u32 4294901760, %v3038_v49 }
  0xfe   :  { %v2590_v32 = vpack.c.bf16 %v4700_v51, %v4698_v19  ;;  %2589 = vmatprep.subr.bf16.mxu0 %v2588_v61  ;;  %2629 = vmatprep.subr.bf16.mxu1 %v4701_v14  ;;  %v3959_v61 = vld [vmem:[#allocation2 + $0x198] sm:$0xff]  ;;  %v4708_v19 = vld [vmem:[#allocation15_spill] sm:$0xff]  ;;  %v4710_v51 = vand.u32 4294901760, %v4709_v8  ;;  %v4711_v14 = vld [vmem:[#allocation13_spill] sm:$0xff]  ;;  %v4721_v8 = vand.u32 4294901760, %v3952_v63 }
  0xff   :  { %v2592_v26 = vpack.c.bf16 %v4705_v28, %v4703_v34  ;;  %v4707_v28 = vand.u32 4294901760, %v3043_v50  ;;  %v4712_v34 = vand.u32 4294901760, %v4711_v14  ;;  %v4713_v49 = vld [vmem:[#allocation16_spill] sm:$0xff]  ;;  %v4714_v50 = vand.u32 4294901760, %v3933_v33 }
 0x100   :  { %772 = vmatmul.mubr.f32.vlgmr.msra.gmra.mrb[2].mxu0 %v3565_v4  ;;  %v4717_v14 = vand.u32 4294901760, %v3096_v2 }
 0x101   :  { %2591 = vmatpush3.bf16.msra.mxu0 %v2590_v32  ;;  %1046 = vmatprep.mubr.f32.mxu0 %v3555_v25  ;;  %v2594_v9 = vpack.c.bf16 %v4707_v28, %v4706_v57  ;;  %v2596_v4 = vpack.c.bf16 %v4712_v34, %v4710_v51  ;;  %v3973_v32 = vld [vmem:[#allocation2 + $0x110] sm:$0xff]  ;;  %v3975_v25 = vld [vmem:[#allocation2 + $0x118] sm:$0xff]  ;;  %v3981_v57 = vsub.f32 %v3933_v33, %v4714_v50  ;;  %v4716_v51 = vand.u32 4294901760, %v3091_v48 }
 0x102   :  { %2631 = vmatpush3.bf16.msra.mxu1 %v4708_v19  ;;  %2593 = vmatprep.subr.bf16.mxu0 %v2592_v26  ;;  %v4715_v26 = vand.u32 4294901760, %v3935_v24  ;;  %v4541_v50 = vand.u32 4294901760, %v3975_v25  ;;  %v4722_v48 = vand.u32 4294901760, %v3954_v52 }
 0x103   :  { %2633 = vmatprep.subr.bf16.mxu1 %v4713_v49  ;;  %v2598_v34 = vpack.c.bf16 %v4717_v14, %v4716_v51  ;;  %v4542_v49 = vand.u32 4294901760, %v3973_v32  ;;  %v4723_v51 = vld [vmem:[#allocation18_spill] sm:$0xff]  ;;  %v4726_v14 = vand.u32 4294901760, %v3147_v62  ;;  %v4730_v62 = vand.u32 4294901760, %v3198_v13 }
 0x104   :  { %v3986_v28 = vsub.f32 %v3935_v24, %v4715_v26  ;;  %v4719_v26 = vand.u32 4294901760, %v3131_v58  ;;  %v4009_v2 = vsub.f32 %v3954_v52, %v4722_v48  ;;  %v4724_v58 = vand.u32 4294901760, %v3957_v18 }
 0x105   :  { %2595 = vmatpush3.bf16.msra.mxu0 %v2594_v9  ;;  %v4004_v9 = vsub.f32 %v3952_v63, %v4721_v8  ;;  %v4731_v13 = vand.u32 4294901760, %v3203_v27 }
 0x106   :  { %2635 = vmatpush3.bf16.msra.mxu1 %v4718_v47  ;;  %2597 = vmatprep.subr.bf16.mxu0 %v2596_v4  ;;  %v2600_v19 = vpack.c.bf16 %v4720_v21, %v4719_v26  ;;  %v4543_v47 = vand.u32 4294901760, %v3981_v57  ;;  %v4544_v4 = vand.u32 4294901760, %v3986_v28  ;;  %v4017_v56 = vsub.f32 %v3957_v18, %v4724_v58 }
 0x107   :  { %2637 = vmatprep.subr.bf16.mxu1 %v4723_v51  ;;  %v4725_v21 = vand.u32 4294901760, %v3959_v61  ;;  %v4727_v26 = vand.u32 4294901760, %v3152_v1  ;;  %v4031_v51 = vsub.f32 %v3973_v32, %v4542_v49  ;;  %v4036_v58 = vsub.f32 %v3975_v25, %v4541_v50  ;;  %v4733_v49 = vld [vmem:[#allocation20_spill] sm:$0xff] }
 0x108   :  { %v4549_v1 = vand.u32 4294901760, %v4004_v9 }
 0x109   :  { %v4022_v8 = vsub.f32 %v3959_v61, %v4725_v21  ;;  %2599 = vmatpush3.bf16.msra.mxu0 %v2598_v34  ;;  %v2602_v48 = vpack.c.bf16 %v4727_v26, %v4726_v14  ;;  %4728 = vst [vmem:[#allocation8_spill] sm:$0xff] %v4036_v58  ;;  %v4729_v34 = vand.u32 4294901760, %v3193_v12  ;;  %v4545_v14 = vand.u32 4294901760, %v4009_v2 }
 0x10a   :  { %2639 = vmatpush3.bf16.msra.mxu1 %v4637_v43  ;;  %2601 = vmatprep.subr.bf16.mxu0 %v2600_v19  ;;  %v1385_v26 = vsub.f32 %v3981_v57, %v4543_v47  ;;  %v1392_v43 = vsub.f32 %v3986_v28, %v4544_v4  ;;  %v4548_v50 = vand.u32 4294901760, %v4036_v58  ;;  %v4734_v47 = vand.u32 4294901760, %v3255_v55 }
 0x10b   :  { %v2604_v21 = vpack.c.bf16 %v4730_v62, %v4729_v34  ;;  %2641 = vmatprep.subr.bf16.mxu1 %v3405_v6  ;;  %v4547_v12 = vand.u32 4294901760, %v4022_v8  ;;  %v4732_v34 = vand.u32 4294901760, %v3208_v10  ;;  %v4546_v6 = vand.u32 4294901760, %v4031_v51  ;;  %v4736_v10 = vld [vmem:[#allocation21_spill] sm:$0xff] }
 0x10c   :  { %v4735_v4 = vand.u32 4294901760, %v3260_v54  ;;  %v1280_v27 = vsub.f32 %v4009_v2, %v4545_v14  ;;  %v4738_v54 = vand.u32 4294901760, %v3275_v36  ;;  %v4740_v14 = vand.u32 4294901760, %v3323_v29 }
 0x10d   :  { %2603 = vmatpush3.bf16.msra.mxu0 %v2602_v48  ;;  %v2606_v62 = vpack.c.bf16 %v4732_v34, %v4731_v13  ;;  %v1273_v48 = vsub.f32 %v4004_v9, %v4549_v1  ;;  %v1386_v13 = vand.u32 4294901760, %v1385_v26  ;;  %v1393_v34 = vand.u32 4294901760, %v1392_v43 }
 0x10e   :  { %2643 = vmatpush3.bf16.msra.mxu1 %v4733_v49  ;;  %2605 = vmatprep.subr.bf16.mxu0 %v2604_v21  ;;  %v2608_v19 = vpack.c.bf16 %v4735_v4, %v4734_v47  ;;  %v4737_v49 = vand.u32 4294901760, %v4017_v56  ;;  %v1406_v55 = vsub.f32 %v4022_v8, %v4547_v12  ;;  %v4739_v47 = vand.u32 4294901760, %v3280_v37  ;;  %v4742_v37 = vld [vmem:[#allocation33_spill] sm:$0xff] }
 0x10f   :  { %2645 = vmatprep.subr.bf16.mxu1 %v4736_v10  ;;  %v4741_v10 = vand.u32 4294901760, %v3334_v7  ;;  %v1287_v43 = vsub.f32 %v4031_v51, %v4546_v6  ;;  %v1274_v36 = vand.u32 4294901760, %v1273_v48  ;;  %v4746_v6 = vld [vmem:[#allocation23_spill] sm:$0xff]  ;;  %v4748_v48 = vand.u32 4294901760, %v3368_v15 }
 0x110   :  { %v1399_v21 = vsub.f32 %v4017_v56, %v4737_v49  ;;  %v2610_v4 = vpack.c.bf16 %v4739_v47, %v4738_v54  ;;  %v1294_v49 = vsub.f32 %v4036_v58, %v4548_v50  ;;  %v4743_v54 = vand.u32 4294901760, %v4742_v37  ;;  %v4744_v47 = vld [vmem:[#allocation34_spill] sm:$0xff] }
 0x111   :  { %2607 = vmatpush3.bf16.msra.mxu0 %v2606_v62  ;;  %v2612_v26 = vpack.c.bf16 %v4741_v10, %v4740_v14  ;;  %v1281_v62 = vand.u32 4294901760, %v1280_v27  ;;  %v4745_v7 = vand.u32 4294901760, %v4744_v47  ;;  %v2684_v10 = vpack.c.bf16 %v1393_v34, %v1386_v13 }
 0x112   :  { %2647 = vmatpush3.bf16.msra.mxu1 %v3435_v40  ;;  %2609 = vmatprep.subr.bf16.mxu0 %v2608_v19  ;;  %v1413_v29 = vsub.f32 %v4742_v37, %v4743_v54  ;;  %v4102_v12 = vsub.f32 %v4746_v6, %v4746_v6  ;;  %v1400_v50 = vand.u32 4294901760, %v1399_v21  ;;  %v1407_v40 = vand.u32 4294901760, %v1406_v55  ;;  %v4749_v37 = vld [vmem:[#allocation35_spill] sm:$0xff] }
 0x113   :  { %v1420_v14 = vsub.f32 %v4744_v47, %v4745_v7  ;;  %2649 = vmatprep.subr.bf16.mxu1 %v3439_v22  ;;  %v4747_v19 = vand.u32 4294901760, %v3359_v59  ;;  %v1288_v54 = vand.u32 4294901760, %v1287_v43  ;;  %v1295_v1 = vand.u32 4294901760, %v1294_v49  ;;  %v4751_v22 = vld [vmem:[#allocation36_spill] sm:$0xff]  ;;  %v4753_v47 = vld [vmem:[#allocation41_spill] sm:$0xff] }
 0x114   :  { %v4750_v58 = vand.u32 4294901760, %v4749_v37  ;;  %v4752_v13 = vand.u32 4294901760, %v4751_v22  ;;  %v2686_v21 = vpack.c.bf16 %v1281_v62, %v1274_v36  ;;  %v1414_v55 = vand.u32 4294901760, %v1413_v29  ;;  %v4761_v29 = vld [vmem:[#allocation22_spill] sm:$0xff] }
 0x115   :  { %v2614_v27 = vpack.c.bf16 %v4748_v48, %v4747_v19  ;;  %2611 = vmatpush3.bf16.msra.mxu0 %v2610_v4  ;;  %v1421_v59 = vand.u32 4294901760, %v1420_v14  ;;  %v4754_v15 = vand.u32 4294901760, %v4753_v47  ;;  %v4755_v43 = vand.u32 4294901760, %v3378_v16 }
 0x116   :  { %v1301_v7 = vsub.f32 %v4749_v37, %v4750_v58  ;;  %v1308_v34 = vsub.f32 %v4751_v22, %v4752_v13  ;;  %2651 = vmatpush3.bf16.msra.mxu1 %v3442_v31  ;;  %2613 = vmatprep.subr.bf16.mxu0 %v2612_v26  ;;  %v4756_v49 = vand.u32 4294901760, %v3384_v30  ;;  %v2688_v19 = vpack.c.bf16 %v1407_v40, %v1400_v50  ;;  %v4757_v13 = vld [vmem:[#allocation42_spill] sm:$0xff] }
 0x117   :  { %v1427_v4 = vsub.f32 %v4753_v47, %v4754_v15  ;;  %2685 = vmatprep.subr.bf16.mxu1 %v2684_v10  ;;  %v1255_v48 = vand.u32 4294901760, %v4102_v12  ;;  %v4758_v22 = vand.u32 4294901760, %v4757_v13  ;;  %v4759_v26 = vand.u32 4294901760, %v3387_v5  ;;  %v4764_v15 = vld [vmem:[#allocation45_spill] sm:$0xff] }
 0x118   :  { %v2616_v58 = vpack.c.bf16 %v4756_v49, %v4755_v43  ;;  %v4760_v36 = vand.u32 4294901760, %v3393_v42  ;;  %v2690_v14 = vpack.c.bf16 %v1295_v1, %v1288_v54  ;;  %v4762_v16 = vand.u32 4294901760, %v3933_v33  ;;  %v4766_v49 = vld [vmem:[#allocation46_spill] sm:$0xff] }
 0x119   :  { %v1434_v31 = vsub.f32 %v4757_v13, %v4758_v22  ;;  %1152 = vmatmul.mubr.f32.vlgmr.msra.gmra.mrb[4].mxu1 %v4761_v29  ;;  %2615 = vmatpush3.bf16.msra.mxu0 %v2614_v27  ;;  %v4763_v30 = vand.u32 4294901760, %v3935_v24  ;;  %v1302_v10 = vand.u32 4294901760, %v1301_v7  ;;  %v1309_v40 = vand.u32 4294901760, %v1308_v34 }
 0x11a   :  { %v2618_v62 = vpack.c.bf16 %v4760_v36, %v4759_v26  ;;  %2687 = vmatpush3.bf16.msra.mxu1 %v2686_v21  ;;  %1494 = vmatprep.mubr.f32.mxu1 %v4746_v6  ;;  %v2692_v22 = vpack.c.bf16 %v1421_v59, %v1414_v55  ;;  %v1428_v5 = vand.u32 4294901760, %v1427_v4  ;;  %v4765_v42 = vand.u32 4294901760, %v4764_v15 }
 0x11b   :  { %v4135_v50 = vpack.c.bf16 %v4763_v30, %v4762_v16  ;;  %v4767_v27 = vand.u32 4294901760, %v4766_v49  ;;  %2617 = vmatprep.subr.bf16.mxu0 %v2616_v58  ;;  %2689 = vmatprep.subr.bf16.mxu1 %v2688_v19  ;;  %v1256_v33 = vsub.f32 %v4102_v12, %v1255_v48  ;;  %v1435_v24 = vand.u32 4294901760, %v1434_v31 }
 0x11c   :  { %v1315_v43 = vsub.f32 %v4764_v15, %v4765_v42  ;;  %v4768_v54 = vand.u32 4294901760, %v3707_v39  ;;  %v4769_v34 = vand.u32 4294901760, %v3712_v23  ;;  %v4770_v55 = vand.u32 4294901760, %v3952_v63 }
 0x11d   :  { %v1322_v1 = vsub.f32 %v4766_v49, %v4767_v27  ;;  %v4771_v59 = vand.u32 4294901760, %v3954_v52  ;;  %2619 = vmatpush3.bf16.msra.mxu0 %v2618_v62  ;;  %v2694_v58 = vpack.c.bf16 %v1309_v40, %v1302_v10  ;;  %v4772_v19 = vand.u32 4294901760, %v3957_v18 }
 0x11e   :  { %v1441_v7 = vsub.f32 %v3707_v39, %v4768_v54  ;;  %v1448_v21 = vsub.f32 %v3712_v23, %v4769_v34  ;;  %v4773_v31 = vand.u32 4294901760, %v3959_v61  ;;  %v4774_v36 = vand.u32 4294901760, %v3721_v44  ;;  %2691 = vmatpush3.bf16.msra.mxu1 %v2690_v14  ;;  %2653 = vmatprep.subr.bf16.mxu0 %v4135_v50 }
 0x11f   :  { %v4157_v4 = vpack.c.bf16 %v4771_v59, %v4770_v55  ;;  %v4775_v30 = vand.u32 4294901760, %v3726_v35  ;;  %v1316_v52 = vand.u32 4294901760, %v1315_v43  ;;  %v1323_v62 = vand.u32 4294901760, %v1322_v1  ;;  %2693 = vmatprep.subr.bf16.mxu1 %v2692_v22 }
 0x120   :  { %v4163_v26 = vpack.c.bf16 %v4773_v31, %v4772_v19  ;;  %v1329_v16 = vsub.f32 %v3721_v44, %v4774_v36  ;;  %v4776_v10 = vand.u32 4294901760, %v3741_v3  ;;  %v4777_v61 = vand.u32 4294901760, %v3746_v20  ;;  %1048 = vmatmul.mubr.f32.vlgmr.msra.gmra.mrb[4].mxu0 %v4761_v29 }
 0x121   :  { %v1336_v63 = vsub.f32 %v3726_v35, %v4775_v30  ;;  %v1257_v42 = vand.u32 4294901760, %v1256_v33  ;;  %v2696_v27 = vpack.c.bf16 %v1435_v24, %v1428_v5  ;;  %v1442_v54 = vand.u32 4294901760, %v1441_v7  ;;  %2655 = vmatpush3.bf16.msra.mxu0 %v4157_v4  ;;  %v4784_v24 = vld [vmem:[#allocation25_spill] sm:$0xff] }
 0x122   :  { %v1455_v18 = vsub.f32 %v3741_v3, %v4776_v10  ;;  %v1462_v40 = vsub.f32 %v3746_v20, %v4777_v61  ;;  %v1449_v34 = vand.u32 4294901760, %v1448_v21  ;;  %v4778_v14 = vand.u32 4294901760, %v3973_v32  ;;  %2695 = vmatpush3.bf16.msra.mxu1 %v2694_v58  ;;  %2657 = vmatprep.subr.bf16.mxu0 %v4163_v26  ;;  %v4788_v61 = vld [vmem:[#allocation27_spill] sm:$0xff] }
 0x123   :  { %v4779_v43 = vand.u32 4294901760, %v3975_v25  ;;  %1258 = vmatprep.mubr.f32.mxu0 %v1257_v42  ;;  %v1330_v55 = vand.u32 4294901760, %v1329_v16  ;;  %v1337_v59 = vand.u32 4294901760, %v1336_v63  ;;  %v4780_v19 = vand.u32 4294901760, %v3781_v45  ;;  %v4782_v25 = vld [vmem:[#allocation24_spill] sm:$0xff]  ;;  %2697 = vmatprep.subr.bf16.mxu1 %v2696_v27 }
 0x124   :  { %v4781_v5 = vand.u32 4294901760, %v3786_v0  ;;  %v2698_v32 = vpack.c.bf16 %v1323_v62, %v1316_v52  ;;  %v4783_v29 = vand.u32 4294901760, %v4782_v25  ;;  %v4785_v7 = vand.u32 4294901760, %v4784_v24  ;;  %v4790_v62 = vld [vmem:[#allocation28_spill] sm:$0xff] }
 0x125   :  { %v4183_v1 = vpack.c.bf16 %v4779_v43, %v4778_v14  ;;  %v1343_v22 = vsub.f32 %v3781_v45, %v4780_v19  ;;  %v1456_v31 = vand.u32 4294901760, %v1455_v18  ;;  %v1463_v36 = vand.u32 4294901760, %v1462_v40  ;;  %v4792_v40 = vld [vmem:[#allocation29_spill] sm:$0xff] }
 0x126   :  { %v1350_v33 = vsub.f32 %v3786_v0, %v4781_v5  ;;  %v4197_v21 = vpack.c.bf16 %v4785_v7, %v4783_v29  ;;  %v2700_v16 = vpack.c.bf16 %v1449_v34, %v1442_v54  ;;  %v4786_v30 = vand.u32 4294901760, %v3817_v60  ;;  %v4794_v54 = vld [vmem:[#allocation30_spill] sm:$0xff]  ;;  %2699 = vmatpush3.bf16.msra.mxu1 %v2698_v32 }
 0x127   :  { %v4787_v10 = vand.u32 4294901760, %v3822_v46  ;;  %v4789_v52 = vand.u32 4294901760, %v4788_v61  ;;  %v4791_v42 = vand.u32 4294901760, %v4790_v62  ;;  %2659 = vmatpush3.bf16.msra.mxu0 %v4183_v1  ;;  %v2702_v18 = vpack.c.bf16 %v1337_v59, %v1330_v55  ;;  %v4802_v61 = vld [vmem:[#allocation32_spill] sm:$0xff] }
 0x128   :  { %v1469_v63 = vsub.f32 %v3817_v60, %v4786_v30  ;;  %v4793_v27 = vand.u32 4294901760, %v4792_v40  ;;  %v4795_v34 = vand.u32 4294901760, %v4794_v54  ;;  %v1344_v19 = vand.u32 4294901760, %v1343_v22  ;;  %2661 = vmatprep.subr.bf16.mxu0 %v4197_v21  ;;  %2701 = vmatprep.subr.bf16.mxu1 %v2700_v16  ;;  %v4804_v16 = vld [vmem:[#allocation37_spill] sm:$0xff] }
 0x129   :  { %v1476_v58 = vsub.f32 %v3822_v46, %v4787_v10  ;;  %v4209_v14 = vpack.c.bf16 %v4791_v42, %v4789_v52  ;;  %v1351_v5 = vand.u32 4294901760, %v1350_v33  ;;  %v2704_v25 = vpack.c.bf16 %v1463_v36, %v1456_v31  ;;  %v4800_v31 = vld [vmem:[#allocation31_spill] sm:$0xff] }
 0x12a   :  { %v4216_v43 = vpack.c.bf16 %v4795_v34, %v4793_v27  ;;  %v4796_v29 = vand.u32 4294901760, %v3839_v17  ;;  %v4797_v7 = vand.u32 4294901760, %v3850_v53  ;;  %v1470_v59 = vand.u32 4294901760, %v1469_v63  ;;  %2703 = vmatpush3.bf16.msra.mxu1 %v2702_v18 }
 0x12b   :  { %v1477_v30 = vand.u32 4294901760, %v1476_v58  ;;  %v4798_v10 = vand.u32 4294901760, %v3855_v38  ;;  %v4799_v33 = vand.u32 4294901760, %v3860_v41  ;;  %2663 = vmatpush3.bf16.msra.mxu0 %v4209_v14  ;;  %v4801_v36 = vand.u32 4294901760, %v4800_v31  ;;  %v4806_v58 = vld [vmem:[#allocation38_spill] sm:$0xff]  ;;  %2705 = vmatprep.subr.bf16.mxu1 %v2704_v25 }
 0x12c   :  { %v1357_v24 = vsub.f32 %v3839_v17, %v4796_v29  ;;  %v1364_v55 = vsub.f32 %v3850_v53, %v4797_v7  ;;  %v4803_v52 = vand.u32 4294901760, %v4802_v61  ;;  %v2706_v42 = vpack.c.bf16 %v1351_v5, %v1344_v19  ;;  %2665 = vmatprep.subr.bf16.mxu0 %v4216_v43  ;;  %v4811_v61 = vld [vmem:[#allocation39_spill] sm:$0xff] }
 0x12d   :  { %v1483_v22 = vsub.f32 %v3855_v38, %v4798_v10  ;;  %v1490_v32 = vsub.f32 %v3860_v41, %v4799_v33  ;;  %v4805_v63 = vand.u32 4294901760, %v4804_v16  ;;  %v4807_v40 = vand.u32 4294901760, %v4806_v58  ;;  %v4809_v10 = vld [vmem:[#allocation64_spill] sm:$0xff] }
 0x12e   :  { %v4236_v62 = vpack.c.bf16 %v4803_v52, %v4801_v36  ;;  %v1358_v54 = vand.u32 4294901760, %v1357_v24  ;;  %v1365_v34 = vand.u32 4294901760, %v1364_v55  ;;  %v4808_v29 = vand.u32 4294901760, %v3873_v11  ;;  %v4813_v52 = vld [vmem:[#allocation40_spill] sm:$0xff]  ;;  %2707 = vmatpush3.bf16.msra.mxu1 %v2706_v42 }
 0x12f   :  { %v4242_v27 = vpack.c.bf16 %v4807_v40, %v4805_v63  ;;  %v4810_v33 = vand.u32 4294901760, %v4809_v10  ;;  %v2708_v19 = vpack.c.bf16 %v1477_v30, %v1470_v59  ;;  %v1484_v5 = vand.u32 4294901760, %v1483_v22  ;;  %v4815_v63 = vld [vmem:[#allocation43_spill] sm:$0xff]  ;;  %v4817_v40 = vld [vmem:[#allocation44_spill] sm:$0xff] }
 0x130   :  { %v1371_v7 = vsub.f32 %v3873_v11, %v4808_v29  ;;  %v1491_v36 = vand.u32 4294901760, %v1490_v32  ;;  %2667 = vmatpush3.bf16.msra.mxu0 %v4236_v62  ;;  %v4812_v18 = vand.u32 4294901760, %v4811_v61  ;;  %v4814_v16 = vand.u32 4294901760, %v4813_v52  ;;  %v4819_v32 = vld [vmem:[#allocation47_spill] sm:$0xff]  ;;  %v4821_v61 = vld [vmem:[#allocation48_spill] sm:$0xff] }
 0x131   :  { %v1378_v31 = vsub.f32 %v4809_v10, %v4810_v33  ;;  %2669 = vmatprep.subr.bf16.mxu0 %v4242_v27  ;;  %v2710_v55 = vpack.c.bf16 %v1365_v34, %v1358_v54  ;;  %v4816_v58 = vand.u32 4294901760, %v4815_v63  ;;  %v4818_v29 = vand.u32 4294901760, %v4817_v40  ;;  %2709 = vmatprep.subr.bf16.mxu1 %v2708_v19  ;;  %v4823_v34 = vld [vmem:[#allocation19_spill] sm:$0xff] }
 0x132   :  { %v4256_v24 = vpack.c.bf16 %v4814_v16, %v4812_v18  ;;  %v1372_v59 = vand.u32 4294901760, %v1371_v7  ;;  %v2712_v22 = vpack.c.bf16 %v1491_v36, %v1484_v5  ;;  %v4820_v33 = vand.u32 4294901760, %v4819_v32  ;;  %v4825_v16 = vld [vmem:[#allocation51_spill] sm:$0xff]  ;;  %v4828_v5 = vld [vmem:[#allocation53_spill] sm:$0xff] }
 0x133   :  { %v4263_v25 = vpack.c.bf16 %v4818_v29, %v4816_v58  ;;  %v1379_v30 = vand.u32 4294901760, %v1378_v31  ;;  %v4822_v18 = vand.u32 4294901760, %v4821_v61  ;;  %2711 = vmatpush3.bf16.msra.mxu1 %v2710_v55  ;;  %v4824_v52 = vand.u32 4294901760, %v4823_v34  ;;  %v4827_v31 = vld [vmem:[#allocation26_spill] sm:$0xff]  ;;  %v4834_v32 = vld [vmem:[#allocation57_spill] sm:$0xff]  ;;  %v4838_v34 = vld [vmem:[#allocation59_spill] sm:$0xff] }
 0x134   :  { %2671 = vmatpush3.bf16.msra.mxu0 %v4256_v24  ;;  %v4826_v63 = vand.u32 4294901760, %v4825_v16  ;;  %v4281_v19 = vsub.f32 %v4827_v31, %v4827_v31  ;;  %2713 = vmatprep.subr.bf16.mxu1 %v2712_v22  ;;  %v4829_v36 = vand.u32 4294901760, %v4828_v5  ;;  %v4830_v58 = vld [vmem:[#allocation54_spill] sm:$0xff]  ;;  %v2718_v5 = vpack.c.bf16 %v4009_v2, %v4004_v9 }
 0x135   :  { %v4270_v42 = vpack.c.bf16 %v4822_v18, %v4820_v33  ;;  %2673 = vmatprep.subr.bf16.mxu0 %v4263_v25  ;;  %v2714_v54 = vpack.c.bf16 %v1379_v30, %v1372_v59  ;;  %v4831_v55 = vand.u32 4294901760, %v4830_v58  ;;  %v4832_v59 = vld [vmem:[#allocation56_spill] sm:$0xff]  ;;  %v4835_v33 = vand.u32 4294901760, %v4834_v32  ;;  %v4836_v61 = vld [vmem:[#allocation58_spill] sm:$0xff] }
 0x136   :  { %v4277_v7 = vpack.c.bf16 %v4826_v63, %v4824_v52  ;;  %v1261_v29 = vand.u32 4294901760, %v4281_v19  ;;  %v4833_v30 = vand.u32 4294901760, %v4832_v59  ;;  %v4837_v18 = vand.u32 4294901760, %v4836_v61  ;;  %v4840_v58 = vld [vmem:[#allocation8_spill] sm:$0xff]  ;;  %v4841_v59 = vld [vmem:[#allocation33_spill] sm:$0xff] }
 0x137   :  { %v4288_v40 = vpack.c.bf16 %v4831_v55, %v4829_v36  ;;  %2715 = vmatpush3.bf16.msra.mxu1 %v2714_v54  ;;  %v4839_v54 = vand.u32 4294901760, %v4838_v34  ;;  %v2716_v63 = vpack.c.bf16 %v3986_v28, %v3981_v57  ;;  %v2722_v55 = vpack.c.bf16 %v4840_v58, %v4031_v51 }
 0x138   :  { %2675 = vmatpush3.bf16.msra.mxu0 %v4270_v42  ;;  %2749 = vmatprep.subr.bf16.mxu1 %v4135_v50  ;;  %v4297_v22 = vpack.c.bf16 %v4835_v33, %v4833_v30  ;;  %v1262_v16 = vsub.f32 %v4281_v19, %v1261_v29  ;;  %v4842_v30 = vld [vmem:[#allocation34_spill] sm:$0xff]  ;;  %v4843_v33 = vld [vmem:[#allocation36_spill] sm:$0xff]  ;;  %v2732_v34 = vpack.c.bf16 %v3712_v23, %v3707_v39 }
 0x139   :  { %2677 = vmatprep.subr.bf16.mxu0 %v4277_v7  ;;  %v4305_v52 = vpack.c.bf16 %v4839_v54, %v4837_v18  ;;  %v2724_v32 = vpack.c.bf16 %v4842_v30, %v4841_v59  ;;  %v2726_v61 = vpack.c.bf16 %v4843_v33, %v4749_v37  ;;  %v2730_v18 = vpack.c.bf16 %v4766_v49, %v4764_v15  ;;  %v4860_v15 = vld [vmem:[#allocation65_spill] sm:$0xff]  ;;  %v4861_v49 = vld [vmem:[#allocation66_spill] sm:$0xff] }
 0x13a   :  { %1496 = vmatmul.mubr.f32.vlgmr.msra.gmra.mrb[6].mxu1 %v4827_v31  ;;  %v1263_v36 = vand.u32 4294901760, %v1262_v16  ;;  %v2734_v37 = vpack.c.bf16 %v3726_v35, %v3721_v44  ;;  %v2740_v39 = vpack.c.bf16 %v3822_v46, %v3817_v60  ;;  %v2742_v44 = vpack.c.bf16 %v3850_v53, %v3839_v17 }
 0x13b   :  { %2751 = vmatpush3.bf16.msra.mxu1 %v4157_v4  ;;  %1738 = vmatprep.mubr.f32.mxu1 %v1255_v48  ;;  %v2720_v48 = vpack.c.bf16 %v4022_v8, %v4017_v56  ;;  %v4847_v35 = vand.u32 4294901760, %v4009_v2  ;;  %v4848_v17 = vand.u32 4294901760, %v4017_v56  ;;  %v4849_v46 = vand.u32 4294901760, %v4022_v8  ;;  %v4854_v2 = vld [vmem:[#allocation52_spill] sm:$0xff]  ;;  %v4855_v56 = vld [vmem:[#allocation55_spill] sm:$0xff] }
 0x13c   :  { %2679 = vmatpush3.bf16.msra.mxu0 %v4288_v40  ;;  %2753 = vmatprep.subr.bf16.mxu1 %v4163_v26  ;;  %v4856_v8 = vld [vmem:[#allocation60_spill] sm:$0xff] }
 0x13d   :  { %2681 = vmatprep.subr.bf16.mxu0 %v4297_v22  ;;  %v2784_v53 = vpack.c.bf16 %v4849_v46, %v4848_v17 }
 0x13f   :  { %2755 = vmatpush3.bf16.msra.mxu1 %v4183_v1 }
 0x140   :  { %2683 = vmatpush3.bf16.msra.mxu0 %v4305_v52  ;;  %2757 = vmatprep.subr.bf16.mxu1 %v4197_v21 }
 0x141   :  { %2717 = vmatprep.subr.bf16.mxu0 %v2716_v63 }
 0x143   :  { %1264 = vmatmul.mubr.f32.vlgmr.msra.gmra.mrb[6].mxu0 %v1263_v36  ;;  %2759 = vmatpush3.bf16.msra.mxu1 %v4209_v14 }
 0x144   :  { %2719 = vmatpush3.bf16.msra.mxu0 %v2718_v5  ;;  %1631 = vmatprep.mubr.f32.mxu0 %v4102_v12  ;;  %v2728_v12 = vpack.c.bf16 %v4757_v13, %v4753_v47  ;;  %v2736_v47 = vpack.c.bf16 %v3746_v20, %v3741_v3  ;;  %v2738_v13 = vpack.c.bf16 %v3786_v0, %v3781_v45  ;;  %v4844_v3 = vand.u32 4294901760, %v3981_v57 }
 0x145   :  { %2721 = vmatprep.subr.bf16.mxu0 %v2720_v48  ;;  %2761 = vmatprep.subr.bf16.mxu1 %v4216_v43  ;;  %v2744_v20 = vpack.c.bf16 %v3860_v41, %v3855_v38  ;;  %v2746_v45 = vpack.c.bf16 %v4809_v10, %v3873_v11  ;;  %v4845_v0 = vand.u32 4294901760, %v3986_v28  ;;  %v4846_v38 = vand.u32 4294901760, %v4004_v9  ;;  %v4852_v28 = vld [vmem:[#allocation49_spill] sm:$0xff]  ;;  %v4853_v9 = vld [vmem:[#allocation50_spill] sm:$0xff] }
 0x146   :  { %v4850_v41 = vand.u32 4294901760, %v4031_v51  ;;  %v4851_v11 = vand.u32 4294901760, %v4840_v58  ;;  %v4857_v51 = vld [vmem:[#allocation61_spill] sm:$0xff] }
 0x147   :  { %2763 = vmatpush3.bf16.msra.mxu1 %v4236_v62  ;;  %v2780_v23 = vpack.c.bf16 %v4845_v0, %v4844_v3  ;;  %v2782_v60 = vpack.c.bf16 %v4847_v35, %v4846_v38 }
 0x148   :  { %2723 = vmatpush3.bf16.msra.mxu0 %v2722_v55  ;;  %2765 = vmatprep.subr.bf16.mxu1 %v4242_v27  ;;  %v2786_v57 = vpack.c.bf16 %v4851_v11, %v4850_v41 }
 0x149   :  { %2725 = vmatprep.subr.bf16.mxu0 %v2724_v32 }
 0x14b   :  { %2767 = vmatpush3.bf16.msra.mxu1 %v4256_v24 }
 0x14c   :  { %2727 = vmatpush3.bf16.msra.mxu0 %v2726_v61  ;;  %2769 = vmatprep.subr.bf16.mxu1 %v4263_v25 }
 0x14d   :  { %2729 = vmatprep.subr.bf16.mxu0 %v2728_v12 }
 0x14f   :  { %2771 = vmatpush3.bf16.msra.mxu1 %v4270_v42 }
 0x150   :  { %2731 = vmatpush3.bf16.msra.mxu0 %v2730_v18  ;;  %2773 = vmatprep.subr.bf16.mxu1 %v4277_v7 }
 0x151   :  { %2733 = vmatprep.subr.bf16.mxu0 %v2732_v34 }
 0x153   :  { %2775 = vmatpush3.bf16.msra.mxu1 %v4288_v40 }
 0x154   :  { %2735 = vmatpush3.bf16.msra.mxu0 %v2734_v37  ;;  %2777 = vmatprep.subr.bf16.mxu1 %v4297_v22 }
 0x155   :  { %2737 = vmatprep.subr.bf16.mxu0 %v2736_v47 }
 0x157   :  { %2779 = vmatpush3.bf16.msra.mxu1 %v4305_v52 }
 0x158   :  { %2739 = vmatpush3.bf16.msra.mxu0 %v2738_v13  ;;  %2813 = vmatprep.subr.bf16.mxu1 %v4135_v50  ;;  %v4859_v50 = vld [vmem:[#allocation63_spill] sm:$0xff] }
 0x159   :  { %2741 = vmatprep.subr.bf16.mxu0 %v2740_v39 }
 0x15a   :  { %1742 = vmatmul.mubr.f32.vlgmr.msra.gmra.mrb[8].mxu1 %v1261_v29 }
 0x15b   :  { %2815 = vmatpush3.bf16.msra.mxu1 %v4157_v4  ;;  %2012 = vmatprep.mubr.f32.mxu1 %v4746_v6  ;;  %v4862_v4 = vld [vmem:[#allocation67_spill] sm:$0xff] }
 0x15c   :  { %2743 = vmatpush3.bf16.msra.mxu0 %v2742_v44  ;;  %2817 = vmatprep.subr.bf16.mxu1 %v4163_v26  ;;  %v4863_v26 = vld [vmem:[#allocation68_spill] sm:$0xff] }
 0x15d   :  { %2745 = vmatprep.subr.bf16.mxu0 %v2744_v20 }
 0x15f   :  { %2819 = vmatpush3.bf16.msra.mxu1 %v4183_v1 }
 0x160   :  { %2747 = vmatpush3.bf16.msra.mxu0 %v2746_v45  ;;  %2821 = vmatprep.subr.bf16.mxu1 %v4197_v21 }
 0x161   :  { %2781 = vmatprep.subr.bf16.mxu0 %v2780_v23 }
 0x163   :  { %1634 = vmatmul.mubr.f32.vlgmr.msra.gmra.mrb[8].mxu0 %v4281_v19  ;;  %2823 = vmatpush3.bf16.msra.mxu1 %v4209_v14 }
 0x164   :  { %2783 = vmatpush3.bf16.msra.mxu0 %v2782_v60  ;;  %1908 = vmatprep.mubr.f32.mxu0 %v4746_v6  ;;  %v4858_v6 = vld [vmem:[#allocation62_spill] sm:$0xff] }
 0x165   :  { %2785 = vmatprep.subr.bf16.mxu0 %v2784_v53  ;;  %2825 = vmatprep.subr.bf16.mxu1 %v4216_v43 }
 0x167   :  { %2827 = vmatpush3.bf16.msra.mxu1 %v4236_v62 }
 0x168   :  { %2787 = vmatpush3.bf16.msra.mxu0 %v2786_v57  ;;  %2829 = vmatprep.subr.bf16.mxu1 %v4242_v27 }
 0x169   :  { %2789 = vmatprep.subr.bf16.mxu0 %v4852_v28 }
 0x16b   :  { %2831 = vmatpush3.bf16.msra.mxu1 %v4256_v24 }
 0x16c   :  { %2791 = vmatpush3.bf16.msra.mxu0 %v4853_v9  ;;  %2833 = vmatprep.subr.bf16.mxu1 %v4263_v25 }
 0x16d   :  { %2793 = vmatprep.subr.bf16.mxu0 %v4854_v2 }
 0x16f   :  { %2835 = vmatpush3.bf16.msra.mxu1 %v4270_v42 }
 0x170   :  { %2795 = vmatpush3.bf16.msra.mxu0 %v4855_v56  ;;  %2837 = vmatprep.subr.bf16.mxu1 %v4277_v7 }
 0x171   :  { %2797 = vmatprep.subr.bf16.mxu0 %v4856_v8 }
 0x173   :  { %2839 = vmatpush3.bf16.msra.mxu1 %v4288_v40 }
 0x174   :  { %2799 = vmatpush3.bf16.msra.mxu0 %v4857_v51  ;;  %2841 = vmatprep.subr.bf16.mxu1 %v4297_v22 }
 0x175   :  { %2801 = vmatprep.subr.bf16.mxu0 %v4858_v6 }
 0x177   :  { %2843 = vmatpush3.bf16.msra.mxu1 %v4305_v52 }
 0x178   :  { %2803 = vmatpush3.bf16.msra.mxu0 %v4859_v50 }
 0x179   :  { %2805 = vmatprep.subr.bf16.mxu0 %v4860_v15 }
 0x17a   :  { %2014 = vmatmul.mubr.f32.vlgmr.msra.gmra.mrb[10].mxu1 %v4827_v31 }
 0x17c   :  { %2807 = vmatpush3.bf16.msra.mxu0 %v4861_v49 }
 0x17d   :  { %2809 = vmatprep.subr.bf16.mxu0 %v4862_v4 }
 0x180   :  { %2811 = vmatpush3.bf16.msra.mxu0 %v4863_v26 }
 0x183   :  { %1910 = vmatmul.mubr.f32.vlgmr.msra.gmra.mrb[10].mxu0 %v4827_v31 }
 0x1a9   :  { %v2107_v1 = vpop.f32.mrb[0].mxu1 }
 0x1aa   :  { %v2108_v21 = vpop.f32.mrb[1].mxu1 }
 0x1ab   :  { %v2109_v14 = vadd.f32 %v2108_v21, %v2107_v1 }
 0x1b1   :  { %v2072_v43 = vpop.f32.mrb[0].mxu0 }
 0x1b2   :  { %v2073_v62 = vpop.f32.mrb[1].mxu0 }
 0x1b3   :  { %v2074_v27 = vadd.f32 %v2073_v62, %v2072_v43 }
 0x1b5   :  { %v636_v10 = vadd.f32 %v2109_v14, %v2074_v27 }
 0x1cb   :  { %v2177_v24 = vpop.f32.mrb[2].mxu1 }
 0x1cc   :  { %v2178_v25 = vpop.f32.mrb[3].mxu1 }
 0x1cd   :  { %v2179_v42 = vadd.f32 %v2178_v25, %v2177_v24 }
 0x1d3   :  { %v2142_v7 = vpop.f32.mrb[2].mxu0 }
 0x1d4   :  { %v2143_v19 = vpop.f32.mrb[3].mxu0 }
 0x1d5   :  { %v2144_v40 = vadd.f32 %v2143_v19, %v2142_v7 }
 0x1d7   :  { %v774_v29 = vadd.f32 %v2144_v40, %v636_v10 }
 0x1d9   :  { %v882_v22 = vadd.f32 %v2179_v42, %v774_v29 }
 0x1ec   :  { %v2247_v54 = vpop.f32.mrb[4].mxu1 }
 0x1ed   :  { %v2248_v52 = vpop.f32.mrb[5].mxu1 }
 0x1ee   :  { %v2249_v16 = vadd.f32 %v2248_v52, %v2247_v54 }
 0x1f3   :  { %v2212_v63 = vpop.f32.mrb[4].mxu0 }
 0x1f4   :  { %v2213_v31 = vpop.f32.mrb[5].mxu0 }
 0x1f5   :  { %v2214_v5 = vadd.f32 %v2213_v31, %v2212_v63 }
 0x1f7   :  { %v1050_v36 = vadd.f32 %v2214_v5, %v882_v22 }
 0x1f9   :  { %v1154_v48 = vadd.f32 %v2249_v16, %v1050_v36 }
 0x20d   :  { %v2317_v58 = vpop.f32.mrb[6].mxu1 }
 0x20e   :  { %v2318_v55 = vpop.f32.mrb[7].mxu1 }
 0x20f   :  { %v2319_v59 = vadd.f32 %v2318_v55, %v2317_v58 }
 0x216   :  { %v2282_v30 = vpop.f32.mrb[6].mxu0 }
 0x217   :  { %v2283_v32 = vpop.f32.mrb[7].mxu0 }
 0x218   :  { %v2284_v33 = vadd.f32 %v2283_v32, %v2282_v30 }
 0x21a   :  { %v1266_v61 = vadd.f32 %v2284_v33, %v1154_v48 }
 0x21c   :  { %v1498_v12 = vadd.f32 %v2319_v59, %v1266_v61 }
 0x22d   :  { %v2387_v18 = vpop.f32.mrb[8].mxu1 }
 0x22e   :  { %v2388_v34 = vpop.f32.mrb[9].mxu1 }
 0x22f   :  { %v2389_v37 = vadd.f32 %v2388_v34, %v2387_v18 }
 0x236   :  { %v2352_v47 = vpop.f32.mrb[8].mxu0 }
 0x237   :  { %v2353_v13 = vpop.f32.mrb[9].mxu0 }
 0x238   :  { %v2354_v39 = vadd.f32 %v2353_v13, %v2352_v47 }
 0x23a   :  { %v1636_v44 = vadd.f32 %v2354_v39, %v1498_v12 }
 0x23c   :  { %v1744_v20 = vadd.f32 %v2389_v37, %v1636_v44 }
 0x24d   :  { %v2457_v45 = vpop.f32.mrb[10].mxu1 }
 0x24e   :  { %v2458_v3 = vpop.f32.mrb[11].mxu1 }
 0x24f   :  { %v2459_v0 = vadd.f32 %v2458_v3, %v2457_v45 }
 0x256   :  { %v2422_v23 = vpop.f32.mrb[10].mxu0 }
 0x257   :  { %v2423_v38 = vpop.f32.mrb[11].mxu0 }
 0x258   :  { %v2424_v35 = vadd.f32 %v2423_v38, %v2422_v23 }
 0x25a   :  { %v1912_v60 = vadd.f32 %v2424_v35, %v1744_v20 }
 0x25c   :  { %v2016_v17 = vadd.f32 %v2459_v0, %v1912_v60 }
 0x25e   :  { %2019 = vst [vmem:[#allocation5] sm:$0xff] %v2016_v17 }
 0x25f   :  { %2894 = shalt.err (!%p2891_p12)
}
 0x260   :  { %s2895_s28 = scalar_lea.hbm %s4423_s2, 128 }
 0x261   :  { %p2896_p13 = scmp.ne.s32.totalorder %s4423_s2, %s2895_s28  ;;  %p2899_p0 = scmp.lt.u32.totalorder %s2895_s28, %s4423_s2 }
 0x263   :  { %p2901_p1 = pnand %p2899_p0, %p2896_p13 }
 0x265   :  { %2904 = shalt.err (!%p2901_p1)
}
 0x266   :  { %2029 = dma.vmem_to_hbm [thread:$0]  %s2027_s1, 128, %s4423_s2, [#allocation4]  }
 0x267   :  { %2907 = dma.done.wait [#allocation4], 128  }
 0x268   :  { %2908 = vsyncadd [#allocation4], 4294967168 }
 0x269   :  { %2033 = vsyncpa [#allocation3], 1 }
 0x26a   :  { %2034 = vsyncpa [#allocation4], 1 }

</bundles_post_ra>
